<compile_context>
chip_gen: v7x
topology: tpu7x:2x2x1
jax: 0.10.0
libtpu: 0.0.40
codegen_flags: <defaults>
</compile_context>

<pallas_src>
import functools
import math

import jax
import jax.numpy as jnp
from jax import lax
from jax.experimental import pallas as pl
from jax.experimental.pallas import tpu as pltpu


def _layernorm(x, eps=1e-5):
    mu = jnp.mean(x, axis=-1, keepdims=True)
    var = jnp.mean((x - mu) ** 2, axis=-1, keepdims=True)
    return (x - mu) * jax.lax.rsqrt(var + eps)


def _graph_corrector_kernel(slots_ref, x_ref, wkv_ref, wslab_ref,
                            slots_out_ref, attn_out_ref, *, scale):
    bb, K, D = slots_ref.shape
    _, N, C = x_ref.shape

    # Leading-axis ref indexing is free (no lane-tile slicing / relayout).
    wk = wkv_ref[0]          # [C, D]  (bf16)
    wv = wkv_ref[1]          # [C, D]  (bf16)
    wq = wslab_ref[0]        # [D, D]
    wu = wslab_ref[1]        # [D, D]
    wg = wslab_ref[2]        # [D, D]

    # ---- batched input projection (the only matmul that scales with N*C) ----
    x = x_ref[...].reshape(bb * N, C)                    # merge batch into rows
    x_n = _layernorm(x).astype(jnp.bfloat16)             # bf16 MXU path
    k = jnp.dot(x_n, wk, preferred_element_type=jnp.float32).reshape(bb, N, D)
    v = jnp.dot(x_n, wv, preferred_element_type=jnp.float32).reshape(bb, N, D)

    # ---- slot-side projections, batched across the whole batch block ----
    s = slots_ref[...]                                    # [bb, K, D]
    s2 = s.reshape(bb * K, D)
    s_n = _layernorm(s2)
    # fold 1/sqrt(D) into q (scales a [bb*K, D] tile, not the [bb, K, N] logits)
    q = (jnp.dot(s_n, wq, preferred_element_type=jnp.float32)
         * scale).reshape(bb, K, D)

    # ---- slot attention (single iteration) ----
    dots = jnp.einsum('bkd,bnd->bkn', q, k,
                      preferred_element_type=jnp.float32)      # [bb, K, N]
    # softmax over the SLOT axis (standard slot attention)
    dots = dots - jnp.max(dots, axis=1, keepdims=True)
    e = jnp.exp(dots)
    attn = e * pl.reciprocal(jnp.sum(e, axis=1, keepdims=True), approx=True)

    # weighted mean over inputs
    attn_w = attn * pl.reciprocal(
        jnp.sum(attn, axis=-1, keepdims=True) + 1e-8, approx=True)
    updates = jnp.einsum('bkn,bnd->bkd', attn_w, v,
                         preferred_element_type=jnp.float32)   # [bb, K, D]

    # residual linear slot update (single matmul for the whole block)
    slots1_2 = s2 + jnp.dot(updates.reshape(bb * K, D), wu,
                            preferred_element_type=jnp.float32)
    slots1 = slots1_2.reshape(bb, K, D)

    # ---- construct_graph.construct(slots, attn) ----
    # scale folded into one operand; contraction on D avoids any transpose
    adj_logits = jnp.einsum('bkd,bjd->bkj', slots1 * scale, slots1,
                            preferred_element_type=jnp.float32)   # [bb, K, K]
    adj_logits = adj_logits - jnp.max(adj_logits, axis=-1, keepdims=True)
    ea = jnp.exp(adj_logits)
    adj = ea * pl.reciprocal(jnp.sum(ea, axis=-1, keepdims=True), approx=True)

    # ---- graph_emb (GCN layer) ----
    h = jnp.dot(slots1_2, wg,
                preferred_element_type=jnp.float32).reshape(bb, K, D)
    refined = jnp.maximum(
        jnp.einsum('bkj,bjd->bkd', adj, h,
                   preferred_element_type=jnp.float32), 0.0)

    slots_out_ref[...] = slots1 + refined
    attn_out_ref[...] = attn


def _default_batch_block(B: int) -> int:
    """Per-generation grid shaping.  v7x: bb=1 so grid=(B,) can be sharded
    across its two TensorCores.  v5e/v6e (single TC): amortize per-step
    overhead with a moderate bb, capped so unrolled live ranges / double
    buffers stay well inside scoped VMEM (16 MiB default on v5e)."""
    try:
        kind = jax.devices()[0].device_kind.lower()
    except Exception:
        kind = ""
    if "v7" in kind or "7x" in kind:
        return 1
    cap = 16 if "v6" in kind else 8
    bb = 1
    for d in range(1, min(B, cap) + 1):
        if B % d == 0:
            bb = d
    return bb


@functools.partial(jax.jit, static_argnames=("batch_block",))
def _graph_corrector_jit(slots, x, wq, wk, wv, wu, wg, *, batch_block):
    B, K, D = slots.shape
    _, N, C = x.shape
    scale = 1.0 / math.sqrt(D)
    bb = batch_block
    grid = (B // bb,)

    # weight packing is folded by XLA (we are under jit), not a per-call op:
    #   * wkv : [2, C, D] bf16 — leading-axis stacked, bf16 MXU operand
    #   * wslab: [3, D, D] f32 — leading-axis stacked (no lane slicing in-kernel)
    wkv = jnp.stack([wk, wv], axis=0).astype(jnp.bfloat16)
    wslab = jnp.stack([wq, wu, wg], axis=0)

    kernel = functools.partial(_graph_corrector_kernel, scale=scale)

    # rough VMEM budget for the block (double-buffered I/O + intermediates)
    blk_bytes = 4 * (bb * N * C + 2 * bb * K * D + bb * K * N
                     + 2 * bb * N * D + 3 * D * D) + 2 * (2 * C * D)
    vmem_limit = int(max(16 << 20, min(48 << 20, 4 * blk_bytes)))

    cost = pl.CostEstimate(
        flops=(4 * B * N * C * D            # k, v projections
               + 6 * B * K * D * D          # q, wu, wg projections
               + 4 * B * K * N * D          # dots + updates
               + 4 * B * K * K * D),        # adj + refined
        transcendentals=B * K * N + B * K * K,
        bytes_accessed=4 * (B * N * C + 2 * B * K * D + B * K * N + 3 * D * D)
                       + 2 * (2 * C * D),
    )

    out_slots, attn = pl.pallas_call(
        kernel,
        out_shape=(
            jax.ShapeDtypeStruct((B, K, D), jnp.float32),
            jax.ShapeDtypeStruct((B, K, N), jnp.float32),
        ),
        grid_spec=pltpu.PrefetchScalarGridSpec(
            num_scalar_prefetch=0,
            grid=grid,
            in_specs=[
                pl.BlockSpec((bb, K, D), lambda b: (b, 0, 0)),
                pl.BlockSpec((bb, N, C), lambda b: (b, 0, 0)),
                pl.BlockSpec((2, C, D), lambda b: (0, 0, 0)),    # wk|wv stack
                pl.BlockSpec((3, D, D), lambda b: (0, 0, 0)),    # wq|wu|wg stack
            ],
            out_specs=[
                # NOTE: slots output stays [bb, K, D] (K*D=128); lane-dense
                # repacking is a scaling-only win here and skipped.
                pl.BlockSpec((bb, K, D), lambda b: (b, 0, 0)),
                pl.BlockSpec((bb, K, N), lambda b: (b, 0, 0)),
            ],
        ),
        compiler_params=pltpu.CompilerParams(
            dimension_semantics=("parallel",),
            vmem_limit_bytes=vmem_limit,
        ),
        cost_estimate=cost,
    )(slots, x, wkv, wslab)
    return out_slots, attn


def graph_corrector(slots, inputs, wq, wk, wv, wu, wg, *, batch_block=None):
    """slots: [B,K,D], inputs: [B,H,W,C] -> (slots_out [B,K,D], attn [B,K,N])."""
    B, K, D = slots.shape
    _, H, W, C = inputs.shape
    x = inputs.reshape(B, H * W, C)              # inputs.flatten(1, 2)
    if batch_block is None:
        batch_block = _default_batch_block(B)
    if B % batch_block != 0:
        batch_block = 1
    return _graph_corrector_jit(slots, x, wq, wk, wv, wu, wg,
                                batch_block=int(batch_block))


def _reference(slots, inputs, wq, wk, wv, wu, wg):
    """Pure-JAX f32 reference for the forward pass."""
    B, K, D = slots.shape
    _, H, W, C = inputs.shape
    x = inputs.reshape(B, H * W, C)
    scale = 1.0 / math.sqrt(D)
    s_n = _layernorm(slots)
    x_n = _layernorm(x)
    q = jnp.einsum("bkd,de->bke", s_n, wq)
    k = jnp.einsum("bnc,cd->bnd", x_n, wk)
    v = jnp.einsum("bnc,cd->bnd", x_n, wv)
    dots = jnp.einsum("bkd,bnd->bkn", q, k) * scale
    attn = jax.nn.softmax(dots, axis=1)
    attn_w = attn / (jnp.sum(attn, axis=-1, keepdims=True) + 1e-8)
    updates = jnp.einsum("bkn,bnd->bkd", attn_w, v)
    slots1 = slots + jnp.einsum("bkd,de->bke", updates, wu)
    adj = jax.nn.softmax(jnp.einsum("bkd,bjd->bkj", slots1, slots1) * scale, axis=-1)
    refined = jax.nn.relu(jnp.einsum("bkj,bjd->bkd", adj,
                                     jnp.einsum("bjd,de->bje", slots1, wg)))
    return slots1 + refined, attn


if __name__ == "__main__":
    B, H, W, C = 2, 16, 16, 32
    K, D = 4, 32

    key = jax.random.PRNGKey(0)
    k1, k2, k3, k4, k5, k6, k7 = jax.random.split(key, 7)
    slots = jax.random.normal(k1, (B, K, D), jnp.float32)
    inputs = jax.random.normal(k2, (B, H, W, C), jnp.float32)
    wq = jax.random.normal(k3, (D, D), jnp.float32) * (1.0 / math.sqrt(D))
    wk = jax.random.normal(k4, (C, D), jnp.float32) * (1.0 / math.sqrt(C))
    wv = jax.random.normal(k5, (C, D), jnp.float32) * (1.0 / math.sqrt(C))
    wu = jax.random.normal(k6, (D, D), jnp.float32) * (1.0 / math.sqrt(D))
    wg = jax.random.normal(k7, (D, D), jnp.float32) * (1.0 / math.sqrt(D))

    out_slots, attn = graph_corrector(slots, inputs, wq, wk, wv, wu, wg)
    jax.block_until_ready((out_slots, attn))

    ref_slots, ref_attn = _reference(slots, inputs, wq, wk, wv, wu, wg)
    # Tolerances account for the bf16 MXU path on the k/v projection and the
    # EUP approx reciprocals (flagged in the review; intentional precision policy).
    assert jnp.allclose(attn, ref_attn, atol=2e-2, rtol=2e-2), \
        float(jnp.max(jnp.abs(attn - ref_attn)))
    assert jnp.allclose(out_slots, ref_slots, atol=5e-2, rtol=5e-2), \
        float(jnp.max(jnp.abs(out_slots - ref_slots)))

    print("KERNEL_OK")
</pallas_src>

<mosaic_0001>
module attributes {stable_mosaic.version = 11 : i64} {
  func.func @_graph_corrector_kernel(%arg0: i32, %arg1: memref<2x4x32xf32, #tpu.memory_space<vmem>>, %arg2: memref<2x256x32xf32, #tpu.memory_space<vmem>>, %arg3: memref<2x32x32xbf16, #tpu.memory_space<vmem>>, %arg4: memref<3x32x32xf32, #tpu.memory_space<vmem>>, %arg5: memref<2x4x32xf32, #tpu.memory_space<vmem>>, %arg6: memref<2x4x256xf32, #tpu.memory_space<vmem>>) attributes {dimension_semantics = [#tpu.dimension_semantics<parallel>], iteration_bounds = array<i64: 1>, scalar_prefetch = 0 : i64, scratch_operands = 0 : i64, tpu.core_type = #tpu.core_type<tc>, window_params = [{transform_indices = @transform_0, window_bounds = array<i64: 2, 4, 32>}, {transform_indices = @transform_1, window_bounds = array<i64: 2, 256, 32>}, {pipeline_mode = #tpu.pipeline_mode<synchronous>, transform_indices = @transform_2, window_bounds = array<i64: 2, 32, 32>}, {pipeline_mode = #tpu.pipeline_mode<synchronous>, transform_indices = @transform_3, window_bounds = array<i64: 3, 32, 32>}, {transform_indices = @transform_4, window_bounds = array<i64: 2, 4, 32>}, {transform_indices = @transform_5, window_bounds = array<i64: 2, 4, 256>}]} {
    %c0 = arith.constant 0 : index
    %c0_0 = arith.constant 0 : index
    %c0_1 = arith.constant 0 : index
    %0 = vector.load %arg3[%c0, %c0_0, %c0_1] : memref<2x32x32xbf16, #tpu.memory_space<vmem>>, vector<1x32x32xbf16>
    %1 = vector.shape_cast %0 : vector<1x32x32xbf16> to vector<32x32xbf16>
    %c1 = arith.constant 1 : index
    %c0_2 = arith.constant 0 : index
    %c0_3 = arith.constant 0 : index
    %2 = vector.load %arg3[%c1, %c0_2, %c0_3] : memref<2x32x32xbf16, #tpu.memory_space<vmem>>, vector<1x32x32xbf16>
    %3 = vector.shape_cast %2 : vector<1x32x32xbf16> to vector<32x32xbf16>
    %c0_4 = arith.constant 0 : index
    %c0_5 = arith.constant 0 : index
    %c0_6 = arith.constant 0 : index
    %4 = vector.load %arg4[%c0_4, %c0_5, %c0_6] : memref<3x32x32xf32, #tpu.memory_space<vmem>>, vector<1x32x32xf32>
    %5 = vector.shape_cast %4 : vector<1x32x32xf32> to vector<32x32xf32>
    %c1_7 = arith.constant 1 : index
    %c0_8 = arith.constant 0 : index
    %c0_9 = arith.constant 0 : index
    %6 = vector.load %arg4[%c1_7, %c0_8, %c0_9] : memref<3x32x32xf32, #tpu.memory_space<vmem>>, vector<1x32x32xf32>
    %7 = vector.shape_cast %6 : vector<1x32x32xf32> to vector<32x32xf32>
    %c2 = arith.constant 2 : index
    %c0_10 = arith.constant 0 : index
    %c0_11 = arith.constant 0 : index
    %8 = vector.load %arg4[%c2, %c0_10, %c0_11] : memref<3x32x32xf32, #tpu.memory_space<vmem>>, vector<1x32x32xf32>
    %9 = vector.shape_cast %8 : vector<1x32x32xf32> to vector<32x32xf32>
    %c0_12 = arith.constant 0 : index
    %c0_13 = arith.constant 0 : index
    %c0_14 = arith.constant 0 : index
    %10 = vector.load %arg2[%c0_12, %c0_13, %c0_14] : memref<2x256x32xf32, #tpu.memory_space<vmem>>, vector<2x256x32xf32>
    %11 = vector.shape_cast %10 : vector<2x256x32xf32> to vector<512x32xf32>
    %cst = arith.constant dense<0.000000e+00> : vector<512xf32>
    %12 = vector.multi_reduction <add>, %11, %cst [1] : vector<512x32xf32> to vector<512xf32>
    %13 = vector.shape_cast %12 : vector<512xf32> to vector<512x1xf32>
    %cst_15 = arith.constant 3.200000e+01 : f32
    %14 = vector.broadcast %cst_15 : f32 to vector<512x1xf32>
    %15 = arith.divf %13, %14 : vector<512x1xf32>
    %16 = vector.broadcast %15 : vector<512x1xf32> to vector<512x32xf32>
    %17 = arith.subf %11, %16 : vector<512x32xf32>
    %18 = arith.mulf %17, %17 : vector<512x32xf32>
    %cst_16 = arith.constant dense<0.000000e+00> : vector<512xf32>
    %19 = vector.multi_reduction <add>, %18, %cst_16 [1] : vector<512x32xf32> to vector<512xf32>
    %20 = vector.shape_cast %19 : vector<512xf32> to vector<512x1xf32>
    %cst_17 = arith.constant 3.200000e+01 : f32
    %21 = vector.broadcast %cst_17 : f32 to vector<512x1xf32>
    %22 = arith.divf %20, %21 : vector<512x1xf32>
    %23 = vector.broadcast %15 : vector<512x1xf32> to vector<512x32xf32>
    %24 = arith.subf %11, %23 : vector<512x32xf32>
    %cst_18 = arith.constant 9.99999974E-6 : f32
    %25 = vector.broadcast %cst_18 : f32 to vector<512x1xf32>
    %26 = arith.addf %22, %25 : vector<512x1xf32>
    %27 = math.rsqrt %26 : vector<512x1xf32>
    %28 = vector.broadcast %27 : vector<512x1xf32> to vector<512x32xf32>
    %29 = arith.mulf %24, %28 : vector<512x32xf32>
    %30 = arith.truncf %29 : vector<512x32xf32> to vector<512x32xbf16>
    %cst_19 = arith.constant dense<0.000000e+00> : vector<512x32xf32>
    %31 = tpu.matmul %30, %1, %cst_19 {dimension_numbers = #tpu.dot_dimension_numbers<[1], [0], [0], [1], [0, 0, 1, 1], [], []>} : vector<512x32xbf16>, vector<32x32xbf16>, vector<512x32xf32> -> vector<512x32xf32>
    %32 = vector.shape_cast %31 : vector<512x32xf32> to vector<2x256x32xf32>
    %cst_20 = arith.constant dense<0.000000e+00> : vector<512x32xf32>
    %33 = tpu.matmul %30, %3, %cst_20 {dimension_numbers = #tpu.dot_dimension_numbers<[1], [0], [0], [1], [0, 0, 1, 1], [], []>} : vector<512x32xbf16>, vector<32x32xbf16>, vector<512x32xf32> -> vector<512x32xf32>
    %34 = vector.shape_cast %33 : vector<512x32xf32> to vector<2x256x32xf32>
    %c0_21 = arith.constant 0 : index
    %c0_22 = arith.constant 0 : index
    %c0_23 = arith.constant 0 : index
    %35 = vector.load %arg1[%c0_21, %c0_22, %c0_23] : memref<2x4x32xf32, #tpu.memory_space<vmem>>, vector<2x4x32xf32>
    %36 = vector.shape_cast %35 : vector<2x4x32xf32> to vector<8x32xf32>
    %cst_24 = arith.constant dense<0.000000e+00> : vector<8xf32>
    %37 = vector.multi_reduction <add>, %36, %cst_24 [1] : vector<8x32xf32> to vector<8xf32>
    %38 = vector.shape_cast %37 : vector<8xf32> to vector<8x1xf32>
    %cst_25 = arith.constant 3.200000e+01 : f32
    %39 = vector.broadcast %cst_25 : f32 to vector<8x1xf32>
    %40 = arith.divf %38, %39 : vector<8x1xf32>
    %41 = vector.broadcast %40 : vector<8x1xf32> to vector<8x32xf32>
    %42 = arith.subf %36, %41 : vector<8x32xf32>
    %43 = arith.mulf %42, %42 : vector<8x32xf32>
    %cst_26 = arith.constant dense<0.000000e+00> : vector<8xf32>
    %44 = vector.multi_reduction <add>, %43, %cst_26 [1] : vector<8x32xf32> to vector<8xf32>
    %45 = vector.shape_cast %44 : vector<8xf32> to vector<8x1xf32>
    %cst_27 = arith.constant 3.200000e+01 : f32
    %46 = vector.broadcast %cst_27 : f32 to vector<8x1xf32>
    %47 = arith.divf %45, %46 : vector<8x1xf32>
    %48 = vector.broadcast %40 : vector<8x1xf32> to vector<8x32xf32>
    %49 = arith.subf %36, %48 : vector<8x32xf32>
    %cst_28 = arith.constant 9.99999974E-6 : f32
    %50 = vector.broadcast %cst_28 : f32 to vector<8x1xf32>
    %51 = arith.addf %47, %50 : vector<8x1xf32>
    %52 = math.rsqrt %51 : vector<8x1xf32>
    %53 = vector.broadcast %52 : vector<8x1xf32> to vector<8x32xf32>
    %54 = arith.mulf %49, %53 : vector<8x32xf32>
    %cst_29 = arith.constant dense<0.000000e+00> : vector<8x32xf32>
    %55 = tpu.matmul %54, %5, %cst_29 {dimension_numbers = #tpu.dot_dimension_numbers<[1], [0], [0], [1], [0, 0, 1, 1], [], []>} : vector<8x32xf32>, vector<32x32xf32>, vector<8x32xf32> -> vector<8x32xf32>
    %cst_30 = arith.constant 0.176776692 : f32
    %56 = vector.broadcast %cst_30 : f32 to vector<8x32xf32>
    %57 = arith.mulf %55, %56 : vector<8x32xf32>
    %58 = vector.shape_cast %57 : vector<8x32xf32> to vector<2x4x32xf32>
    "tpu.trace_start"() <{level = 10 : i32, message = "bkd,bnd->bkn"}> : () -> ()
    %cst_31 = arith.constant dense<0.000000e+00> : vector<2x4x256xf32>
    %59 = tpu.matmul %58, %32, %cst_31 {dimension_numbers = #tpu.dot_dimension_numbers<[2], [2], [1], [1], [0, 0, 0, 1, 1, 1], [0], [0]>} : vector<2x4x32xf32>, vector<2x256x32xf32>, vector<2x4x256xf32> -> vector<2x4x256xf32>
    "tpu.trace_stop"() : () -> ()
    %cst_32 = arith.constant dense<0xFF800000> : vector<2x256xf32>
    %60 = vector.multi_reduction <maximumf>, %59, %cst_32 [1] : vector<2x4x256xf32> to vector<2x256xf32>
    %61 = vector.shape_cast %60 : vector<2x256xf32> to vector<2x1x256xf32>
    %62 = vector.broadcast %61 : vector<2x1x256xf32> to vector<2x4x256xf32>
    %63 = arith.subf %59, %62 : vector<2x4x256xf32>
    %64 = math.exp %63 : vector<2x4x256xf32>
    %cst_33 = arith.constant dense<0.000000e+00> : vector<2x256xf32>
    %65 = vector.multi_reduction <add>, %64, %cst_33 [1] : vector<2x4x256xf32> to vector<2x256xf32>
    %66 = vector.shape_cast %65 : vector<2x256xf32> to vector<2x1x256xf32>
    %67 = tpu.reciprocal %66 {approx = true} : vector<2x1x256xf32> -> vector<2x1x256xf32>
    %68 = vector.broadcast %67 : vector<2x1x256xf32> to vector<2x4x256xf32>
    %69 = arith.mulf %64, %68 : vector<2x4x256xf32>
    %cst_34 = arith.constant dense<0.000000e+00> : vector<2x4xf32>
    %70 = vector.multi_reduction <add>, %69, %cst_34 [2] : vector<2x4x256xf32> to vector<2x4xf32>
    %71 = vector.shape_cast %70 : vector<2x4xf32> to vector<2x4x1xf32>
    %cst_35 = arith.constant 9.99999993E-9 : f32
    %72 = vector.broadcast %cst_35 : f32 to vector<2x4x1xf32>
    %73 = arith.addf %71, %72 : vector<2x4x1xf32>
    %74 = tpu.reciprocal %73 {approx = true} : vector<2x4x1xf32> -> vector<2x4x1xf32>
    %75 = vector.broadcast %74 : vector<2x4x1xf32> to vector<2x4x256xf32>
    %76 = arith.mulf %69, %75 : vector<2x4x256xf32>
    "tpu.trace_start"() <{level = 10 : i32, message = "bkn,bnd->bkd"}> : () -> ()
    %cst_36 = arith.constant dense<0.000000e+00> : vector<2x4x32xf32>
    %77 = tpu.matmul %76, %34, %cst_36 {dimension_numbers = #tpu.dot_dimension_numbers<[2], [1], [1], [2], [0, 0, 0, 1, 1, 2], [0], [0]>} : vector<2x4x256xf32>, vector<2x256x32xf32>, vector<2x4x32xf32> -> vector<2x4x32xf32>
    "tpu.trace_stop"() : () -> ()
    %78 = vector.shape_cast %77 : vector<2x4x32xf32> to vector<8x32xf32>
    %cst_37 = arith.constant dense<0.000000e+00> : vector<8x32xf32>
    %79 = tpu.matmul %78, %7, %cst_37 {dimension_numbers = #tpu.dot_dimension_numbers<[1], [0], [0], [1], [0, 0, 1, 1], [], []>} : vector<8x32xf32>, vector<32x32xf32>, vector<8x32xf32> -> vector<8x32xf32>
    %80 = arith.addf %36, %79 : vector<8x32xf32>
    %81 = vector.shape_cast %80 : vector<8x32xf32> to vector<2x4x32xf32>
    %cst_38 = arith.constant 0.176776692 : f32
    %82 = vector.broadcast %cst_38 : f32 to vector<2x4x32xf32>
    %83 = arith.mulf %81, %82 : vector<2x4x32xf32>
    "tpu.trace_start"() <{level = 10 : i32, message = "bkd,bjd->bkj"}> : () -> ()
    %cst_39 = arith.constant dense<0.000000e+00> : vector<2x4x4xf32>
    %84 = tpu.matmul %83, %81, %cst_39 {dimension_numbers = #tpu.dot_dimension_numbers<[2], [2], [1], [1], [0, 0, 0, 1, 1, 1], [0], [0]>} : vector<2x4x32xf32>, vector<2x4x32xf32>, vector<2x4x4xf32> -> vector<2x4x4xf32>
    "tpu.trace_stop"() : () -> ()
    %cst_40 = arith.constant dense<0xFF800000> : vector<2x4xf32>
    %85 = vector.multi_reduction <maximumf>, %84, %cst_40 [2] : vector<2x4x4xf32> to vector<2x4xf32>
    %86 = vector.shape_cast %85 : vector<2x4xf32> to vector<2x4x1xf32>
    %87 = vector.broadcast %86 : vector<2x4x1xf32> to vector<2x4x4xf32>
    %88 = arith.subf %84, %87 : vector<2x4x4xf32>
    %89 = math.exp %88 : vector<2x4x4xf32>
    %cst_41 = arith.constant dense<0.000000e+00> : vector<2x4xf32>
    %90 = vector.multi_reduction <add>, %89, %cst_41 [2] : vector<2x4x4xf32> to vector<2x4xf32>
    %91 = vector.shape_cast %90 : vector<2x4xf32> to vector<2x4x1xf32>
    %92 = tpu.reciprocal %91 {approx = true} : vector<2x4x1xf32> -> vector<2x4x1xf32>
    %93 = vector.broadcast %92 : vector<2x4x1xf32> to vector<2x4x4xf32>
    %94 = arith.mulf %89, %93 : vector<2x4x4xf32>
    %cst_42 = arith.constant dense<0.000000e+00> : vector<8x32xf32>
    %95 = tpu.matmul %80, %9, %cst_42 {dimension_numbers = #tpu.dot_dimension_numbers<[1], [0], [0], [1], [0, 0, 1, 1], [], []>} : vector<8x32xf32>, vector<32x32xf32>, vector<8x32xf32> -> vector<8x32xf32>
    %96 = vector.shape_cast %95 : vector<8x32xf32> to vector<2x4x32xf32>
    "tpu.trace_start"() <{level = 10 : i32, message = "bkj,bjd->bkd"}> : () -> ()
    %cst_43 = arith.constant dense<0.000000e+00> : vector<2x4x32xf32>
    %97 = tpu.matmul %94, %96, %cst_43 {dimension_numbers = #tpu.dot_dimension_numbers<[2], [1], [1], [2], [0, 0, 0, 1, 1, 2], [0], [0]>} : vector<2x4x4xf32>, vector<2x4x32xf32>, vector<2x4x32xf32> -> vector<2x4x32xf32>
    "tpu.trace_stop"() : () -> ()
    %cst_44 = arith.constant 0.000000e+00 : f32
    %98 = vector.broadcast %cst_44 : f32 to vector<2x4x32xf32>
    %99 = arith.maximumf %97, %98 : vector<2x4x32xf32>
    %100 = arith.addf %81, %99 : vector<2x4x32xf32>
    %c0_45 = arith.constant 0 : index
    %c0_46 = arith.constant 0 : index
    %c0_47 = arith.constant 0 : index
    %101 = vector.load %arg5[%c0_45, %c0_46, %c0_47] : memref<2x4x32xf32, #tpu.memory_space<vmem>>, vector<2x4x32xf32>
    tpu.vector_store %arg5[%c0_45, %c0_46, %c0_47], %100 {strides = array<i32>} : memref<2x4x32xf32, #tpu.memory_space<vmem>>, vector<2x4x32xf32>,
    %c0_48 = arith.constant 0 : index
    %c0_49 = arith.constant 0 : index
    %c0_50 = arith.constant 0 : index
    %102 = vector.load %arg6[%c0_48, %c0_49, %c0_50] : memref<2x4x256xf32, #tpu.memory_space<vmem>>, vector<2x4x256xf32>
    tpu.vector_store %arg6[%c0_48, %c0_49, %c0_50], %69 {strides = array<i32>} : memref<2x4x256xf32, #tpu.memory_space<vmem>>, vector<2x4x256xf32>,
    return
  }
  func.func @transform_0(%arg0: i32) -> (i32, i32, i32) {
    %c0_i32 = arith.constant 0 : i32
    %c0_i32_0 = arith.constant 0 : i32
    %c0_i32_1 = arith.constant 0 : i32
    return %arg0, %c0_i32, %c0_i32_0 : i32, i32, i32
  }
  func.func @transform_1(%arg0: i32) -> (i32, i32, i32) {
    %c0_i32 = arith.constant 0 : i32
    %c0_i32_0 = arith.constant 0 : i32
    %c0_i32_1 = arith.constant 0 : i32
    return %arg0, %c0_i32, %c0_i32_0 : i32, i32, i32
  }
  func.func @transform_2(%arg0: i32) -> (i32, i32, i32) {
    %c0_i32 = arith.constant 0 : i32
    %c0_i32_0 = arith.constant 0 : i32
    %c0_i32_1 = arith.constant 0 : i32
    %c0_i32_2 = arith.constant 0 : i32
    return %c0_i32, %c0_i32_0, %c0_i32_1 : i32, i32, i32
  }
  func.func @transform_3(%arg0: i32) -> (i32, i32, i32) {
    %c0_i32 = arith.constant 0 : i32
    %c0_i32_0 = arith.constant 0 : i32
    %c0_i32_1 = arith.constant 0 : i32
    %c0_i32_2 = arith.constant 0 : i32
    return %c0_i32, %c0_i32_0, %c0_i32_1 : i32, i32, i32
  }
  func.func @transform_4(%arg0: i32) -> (i32, i32, i32) {
    %c0_i32 = arith.constant 0 : i32
    %c0_i32_0 = arith.constant 0 : i32
    %c0_i32_1 = arith.constant 0 : i32
    return %arg0, %c0_i32, %c0_i32_0 : i32, i32, i32
  }
  func.func @transform_5(%arg0: i32) -> (i32, i32, i32) {
    %c0_i32 = arith.constant 0 : i32
    %c0_i32_0 = arith.constant 0 : i32
    %c0_i32_1 = arith.constant 0 : i32
    return %arg0, %c0_i32, %c0_i32_0 : i32, i32, i32
  }
}

</mosaic_0001>

<bundles_post_ra>
// kernel: _graph_corrector_jit.1
= control target key start
LH: loop header
LB: loop body
LE: loop exit
PB: predicated region body
PF: predicated region fallthrough
CT: control target
= control target key end

     0   :  { %11 = vsyncpa [#allocation3], 0  ;;  %vm109_vm0 = vcmask 261120   ;;  %s5528_s0 = inlined_call_operand.vmem [shape: f32[2,4,32], index: 0, kind: input, shape index: {}]   ;;  %s5529_s1 = inlined_call_operand.vmem [shape: f32[2,256,32], index: 1, kind: input, shape index: {}]   ;;  %s5530_s2 = inlined_call_operand.vmem [shape: bf16[2,32,32], index: 2, kind: input, shape index: {}]   ;;  %s5531_s3 = inlined_call_operand.vmem [shape: f32[3,32,32], index: 3, kind: input, shape index: {}]   ;;  %s5532_s4 = inlined_call_operand.hbm [shape: f32[2,4,32], index: 4, kind: output, shape index: {0}]   ;;  %s5533_s5 = inlined_call_operand.hbm [shape: f32[2,4,256], index: 5, kind: output, shape index: {1}]  }
   0x1   :  { %v3937_v0 = vld [vmem:[%s5529_s1] sm:$0xff]  ;;  %v3942_v1 = vld [vmem:[%s5529_s1 + $0x10] sm:$0xff]  ;;  %v3947_v2 = vld [vmem:[%s5529_s1 + $0x8] sm:$0xff] }
   0x2   :  { %v110_v3 = vsel %vm109_vm0, %v3937_v0, 0.0  ;;  %v116_v4 = vsel %vm109_vm0, %v3942_v1, 0.0  ;;  %v3956_v5 = vld [vmem:[%s5529_s1 + $0x18] sm:$0xff]  ;;  %v113_v6 = vsel %vm109_vm0, %v3947_v2, 0.0  ;;  %v3965_v8 = vld [vmem:[%s5529_s1 + $0x20] sm:$0xff]  ;;  %v3970_v9 = vld [vmem:[%s5529_s1 + $0x28] sm:$0xff] }
   0x3   :  { %111 = vadd.xlane.f32.xlu0 %v110_v3  ;;  %117 = vadd.xlane.f32.xlu1 %v116_v4  ;;  %v119_v7 = vsel %vm109_vm0, %v3956_v5, 0.0  ;;  %v122_v10 = vsel %vm109_vm0, %v3965_v8, 0.0  ;;  %v125_v11 = vsel %vm109_vm0, %v3970_v9, 0.0  ;;  %v3979_v12 = vld [vmem:[%s5529_s1 + $0x30] sm:$0xff]  ;;  %v3984_v13 = vld [vmem:[%s5529_s1 + $0x38] sm:$0xff]  ;;  %v3993_v16 = vld [vmem:[%s5529_s1 + $0x40] sm:$0xff] }
   0x4   :  { %v128_v14 = vsel %vm109_vm0, %v3979_v12, 0.0  ;;  %v131_v15 = vsel %vm109_vm0, %v3984_v13, 0.0  ;;  %v3998_v17 = vld [vmem:[%s5529_s1 + $0x48] sm:$0xff]  ;;  %v134_v18 = vsel %vm109_vm0, %v3993_v16, 0.0  ;;  %v4007_v20 = vld [vmem:[%s5529_s1 + $0x50] sm:$0xff]  ;;  %v4012_v21 = vld [vmem:[%s5529_s1 + $0x58] sm:$0xff] }
   0x5   :  { %v137_v19 = vsel %vm109_vm0, %v3998_v17, 0.0  ;;  %v140_v22 = vsel %vm109_vm0, %v4007_v20, 0.0  ;;  %v4019_v23 = vld [vmem:[%s5529_s1 + $0x60] sm:$0xff]  ;;  %v143_v24 = vsel %vm109_vm0, %v4012_v21, 0.0  ;;  %v4026_v25 = vld [vmem:[%s5529_s1 + $0x68] sm:$0xff] }
   0x7   :  { %114 = vadd.xlane.f32.xlu0 %v113_v6  ;;  %120 = vadd.xlane.f32.xlu1 %v119_v7 }
   0xb   :  { %123 = vadd.xlane.f32.xlu0 %v122_v10  ;;  %126 = vadd.xlane.f32.xlu1 %v125_v11 }
   0xf   :  { %129 = vadd.xlane.f32.xlu0 %v128_v14  ;;  %132 = vadd.xlane.f32.xlu1 %v131_v15 }
  0x13   :  { %135 = vadd.xlane.f32.xlu0 %v134_v18  ;;  %138 = vadd.xlane.f32.xlu1 %v137_v19 }
  0x17   :  { %141 = vadd.xlane.f32.xlu0 %v140_v22  ;;  %144 = vadd.xlane.f32.xlu1 %v143_v24 }
  0x18   :  { %12 = vsyncpa [#allocation5], 0  ;;  %v146_v26 = vsel %vm109_vm0, %v4019_v23, 0.0  ;;  %v149_v27 = vsel %vm109_vm0, %v4026_v25, 0.0  ;;  %v4035_v28 = vld [vmem:[%s5529_s1 + $0x70] sm:$0xff]  ;;  %v4040_v29 = vld [vmem:[%s5529_s1 + $0x78] sm:$0xff] }
  0x19   :  { %v152_v30 = vsel %vm109_vm0, %v4035_v28, 0.0  ;;  %v155_v31 = vsel %vm109_vm0, %v4040_v29, 0.0  ;;  %v4049_v32 = vld [vmem:[%s5529_s1 + $0x80] sm:$0xff]  ;;  %v4054_v33 = vld [vmem:[%s5529_s1 + $0x88] sm:$0xff]  ;;  %v4063_v36 = vld [vmem:[%s5529_s1 + $0x90] sm:$0xff]  ;;  %vm3896_vm1 = vmmov 0  }
  0x1a   :  { %v158_v34 = vsel %vm109_vm0, %v4049_v32, 0.0  ;;  %v161_v35 = vsel %vm109_vm0, %v4054_v33, 0.0  ;;  %v4068_v37 = vld [vmem:[%s5529_s1 + $0x98] sm:$0xff]  ;;  %v164_v38 = vsel %vm109_vm0, %v4063_v36, 0.0  ;;  %v4077_v40 = vld [vmem:[%s5529_s1 + $0xa0] sm:$0xff]  ;;  %v4082_v41 = vld [vmem:[%s5529_s1 + $0xa8] sm:$0xff] }
  0x1b   :  { %147 = vadd.xlane.f32.xlu0 %v146_v26  ;;  %150 = vadd.xlane.f32.xlu1 %v149_v27  ;;  %v167_v39 = vsel %vm109_vm0, %v4068_v37, 0.0  ;;  %v170_v42 = vsel %vm109_vm0, %v4077_v40, 0.0  ;;  %v173_v43 = vsel %vm109_vm0, %v4082_v41, 0.0  ;;  %v4091_v44 = vld [vmem:[%s5529_s1 + $0xb0] sm:$0xff]  ;;  %v4096_v45 = vld [vmem:[%s5529_s1 + $0xb8] sm:$0xff]  ;;  %v4105_v48 = vld [vmem:[%s5529_s1 + $0xc8] sm:$0xff] }
  0x1c   :  { %v176_v46 = vsel %vm109_vm0, %v4091_v44, 0.0  ;;  %v179_v47 = vsel %vm109_vm0, %v4096_v45, 0.0  ;;  %v4110_v49 = vld [vmem:[%s5529_s1 + $0xc0] sm:$0xff]  ;;  %v185_v50 = vsel %vm109_vm0, %v4105_v48, 0.0  ;;  %v4119_v52 = vld [vmem:[%s5529_s1 + $0xd8] sm:$0xff]  ;;  %v4124_v53 = vld [vmem:[%s5529_s1 + $0xd0] sm:$0xff] }
  0x1d   :  { %v182_v51 = vsel %vm109_vm0, %v4110_v49, 0.0  ;;  %v191_v54 = vsel %vm109_vm0, %v4119_v52, 0.0  ;;  %v188_v55 = vsel %vm109_vm0, %v4124_v53, 0.0  ;;  %v4133_v56 = vld [vmem:[%s5529_s1 + $0xe8] sm:$0xff]  ;;  %v4138_v57 = vld [vmem:[%s5529_s1 + $0xe0] sm:$0xff]  ;;  %v4147_v60 = vld [vmem:[%s5529_s1 + $0xf8] sm:$0xff] }
  0x1e   :  { %v197_v58 = vsel %vm109_vm0, %v4133_v56, 0.0  ;;  %v194_v59 = vsel %vm109_vm0, %v4138_v57, 0.0  ;;  %v4152_v61 = vld [vmem:[%s5529_s1 + $0xf0] sm:$0xff]  ;;  %v203_v62 = vsel %vm109_vm0, %v4147_v60, 0.0  ;;  %v4161_v3 = vld [vmem:[%s5529_s1 + $0x108] sm:$0xff]  ;;  %v4166_v4 = vld [vmem:[%s5529_s1 + $0x100] sm:$0xff] }
  0x1f   :  { %153 = vadd.xlane.f32.xlu0 %v152_v30  ;;  %156 = vadd.xlane.f32.xlu1 %v155_v31  ;;  %v200_v63 = vsel %vm109_vm0, %v4152_v61, 0.0  ;;  %v209_v6 = vsel %vm109_vm0, %v4161_v3, 0.0  ;;  %v206_v7 = vsel %vm109_vm0, %v4166_v4, 0.0  ;;  %v4175_v10 = vld [vmem:[%s5529_s1 + $0x118] sm:$0xff]  ;;  %v4180_v11 = vld [vmem:[%s5529_s1 + $0x110] sm:$0xff]  ;;  %v4189_v18 = vld [vmem:[%s5529_s1 + $0x128] sm:$0xff] }
  0x20   :  { %v215_v14 = vsel %vm109_vm0, %v4175_v10, 0.0  ;;  %v212_v15 = vsel %vm109_vm0, %v4180_v11, 0.0  ;;  %v4194_v19 = vld [vmem:[%s5529_s1 + $0x120] sm:$0xff]  ;;  %v221_v22 = vsel %vm109_vm0, %v4189_v18, 0.0  ;;  %v4203_v26 = vld [vmem:[%s5529_s1 + $0x138] sm:$0xff]  ;;  %v4208_v27 = vld [vmem:[%s5529_s1 + $0x130] sm:$0xff] }
  0x21   :  { %v218_v24 = vsel %vm109_vm0, %v4194_v19, 0.0  ;;  %v227_v30 = vsel %vm109_vm0, %v4203_v26, 0.0  ;;  %v224_v31 = vsel %vm109_vm0, %v4208_v27, 0.0  ;;  %vm5053_vm2 = vmpackc.low %vm109_vm0, %vm109_vm0  ;;  %vm2149_vm3 = vcmask 1043456  }
  0x22   :  { %vm2618_vm4 = vcmask 27648   ;;  %vm2716_vm5 = vcmask 31744  }
  0x23   :  { %159 = vadd.xlane.f32.xlu0 %v158_v34  ;;  %162 = vadd.xlane.f32.xlu1 %v161_v35  ;;  %v4217_v34 = vld [vmem:[%s5529_s1 + $0x148] sm:$0xff]  ;;  %v4222_v35 = vld [vmem:[%s5529_s1 + $0x140] sm:$0xff] }
  0x27   :  { %165 = vadd.xlane.f32.xlu0 %v164_v38  ;;  %168 = vadd.xlane.f32.xlu1 %v167_v39  ;;  %v233_v38 = vsel %vm109_vm0, %v4217_v34, 0.0  ;;  %v230_v39 = vsel %vm109_vm0, %v4222_v35, 0.0 }
  0x2b   :  { %171 = vadd.xlane.f32.xlu0 %v170_v42  ;;  %174 = vadd.xlane.f32.xlu1 %v173_v43  ;;  %v4231_v42 = vld [vmem:[%s5529_s1 + $0x158] sm:$0xff]  ;;  %v4236_v43 = vld [vmem:[%s5529_s1 + $0x150] sm:$0xff] }
  0x2f   :  { %177 = vadd.xlane.f32.xlu0 %v176_v46  ;;  %180 = vadd.xlane.f32.xlu1 %v179_v47  ;;  %v239_v46 = vsel %vm109_vm0, %v4231_v42, 0.0  ;;  %v236_v47 = vsel %vm109_vm0, %v4236_v43, 0.0 }
  0x33   :  { %186 = vadd.xlane.f32.xlu1 %v185_v50  ;;  %183 = vadd.xlane.f32.xlu0 %v182_v51  ;;  %v4245_v50 = vld [vmem:[%s5529_s1 + $0x168] sm:$0xff]  ;;  %v4250_v51 = vld [vmem:[%s5529_s1 + $0x160] sm:$0xff] }
  0x37   :  { %192 = vadd.xlane.f32.xlu1 %v191_v54  ;;  %189 = vadd.xlane.f32.xlu0 %v188_v55  ;;  %v245_v54 = vsel %vm109_vm0, %v4245_v50, 0.0  ;;  %v242_v55 = vsel %vm109_vm0, %v4250_v51, 0.0 }
  0x3b   :  { %198 = vadd.xlane.f32.xlu1 %v197_v58  ;;  %195 = vadd.xlane.f32.xlu0 %v194_v59  ;;  %v4259_v58 = vld [vmem:[%s5529_s1 + $0x178] sm:$0xff]  ;;  %v4264_v59 = vld [vmem:[%s5529_s1 + $0x170] sm:$0xff] }
  0x3f   :  { %204 = vadd.xlane.f32.xlu1 %v203_v62  ;;  %201 = vadd.xlane.f32.xlu0 %v200_v63  ;;  %v251_v62 = vsel %vm109_vm0, %v4259_v58, 0.0  ;;  %v248_v63 = vsel %vm109_vm0, %v4264_v59, 0.0 }
  0x43   :  { %210 = vadd.xlane.f32.xlu1 %v209_v6  ;;  %207 = vadd.xlane.f32.xlu0 %v206_v7  ;;  %v4273_v6 = vld [vmem:[%s5529_s1 + $0x188] sm:$0xff]  ;;  %v4278_v7 = vld [vmem:[%s5529_s1 + $0x180] sm:$0xff] }
  0x47   :  { %216 = vadd.xlane.f32.xlu1 %v215_v14  ;;  %213 = vadd.xlane.f32.xlu0 %v212_v15  ;;  %v257_v14 = vsel %vm109_vm0, %v4273_v6, 0.0  ;;  %v254_v15 = vsel %vm109_vm0, %v4278_v7, 0.0 }
  0x4b   :  { %222 = vadd.xlane.f32.xlu1 %v221_v22  ;;  %219 = vadd.xlane.f32.xlu0 %v218_v24  ;;  %v4287_v22 = vld [vmem:[%s5529_s1 + $0x198] sm:$0xff]  ;;  %v4292_v24 = vld [vmem:[%s5529_s1 + $0x190] sm:$0xff] }
  0x4c   :  { %5578 = vst [vmem:[#allocation8_spill] sm:$0xff] %v4287_v22  ;;  %5579 = vst [vmem:[#allocation9_spill] sm:$0xff] %v4292_v24 }
  0x4f   :  { %228 = vadd.xlane.f32.xlu1 %v227_v30  ;;  %225 = vadd.xlane.f32.xlu0 %v224_v31  ;;  %v263_v30 = vsel %vm109_vm0, %v4287_v22, 0.0  ;;  %v260_v31 = vsel %vm109_vm0, %v4292_v24, 0.0 }
  0x53   :  { %234 = vadd.xlane.f32.xlu1 %v233_v38  ;;  %231 = vadd.xlane.f32.xlu0 %v230_v39  ;;  %v4301_v38 = vld [vmem:[%s5529_s1 + $0x1a8] sm:$0xff]  ;;  %v4306_v39 = vld [vmem:[%s5529_s1 + $0x1a0] sm:$0xff] }
  0x54   :  { %5580 = vst [vmem:[#allocation10_spill] sm:$0xff] %v4301_v38  ;;  %5581 = vst [vmem:[#allocation11_spill] sm:$0xff] %v4306_v39 }
  0x57   :  { %240 = vadd.xlane.f32.xlu1 %v239_v46  ;;  %237 = vadd.xlane.f32.xlu0 %v236_v47  ;;  %v269_v46 = vsel %vm109_vm0, %v4301_v38, 0.0  ;;  %v266_v47 = vsel %vm109_vm0, %v4306_v39, 0.0 }
  0x5b   :  { %246 = vadd.xlane.f32.xlu1 %v245_v54  ;;  %243 = vadd.xlane.f32.xlu0 %v242_v55  ;;  %v4315_v54 = vld [vmem:[%s5529_s1 + $0x1b8] sm:$0xff]  ;;  %v4320_v55 = vld [vmem:[%s5529_s1 + $0x1b0] sm:$0xff] }
  0x5c   :  { %5582 = vst [vmem:[#allocation12_spill] sm:$0xff] %v4315_v54 }
  0x5f   :  { %252 = vadd.xlane.f32.xlu1 %v251_v62  ;;  %249 = vadd.xlane.f32.xlu0 %v248_v63  ;;  %v275_v62 = vsel %vm109_vm0, %v4315_v54, 0.0  ;;  %v272_v63 = vsel %vm109_vm0, %v4320_v55, 0.0 }
  0x63   :  { %258 = vadd.xlane.f32.xlu1 %v257_v14  ;;  %255 = vadd.xlane.f32.xlu0 %v254_v15 }
  0x67   :  { %264 = vadd.xlane.f32.xlu1 %v263_v30  ;;  %261 = vadd.xlane.f32.xlu0 %v260_v31 }
  0x6b   :  { %270 = vadd.xlane.f32.xlu1 %v269_v46  ;;  %267 = vadd.xlane.f32.xlu0 %v266_v47 }
  0x6f   :  { %276 = vadd.xlane.f32.xlu1 %v275_v62  ;;  %273 = vadd.xlane.f32.xlu0 %v272_v63 }
  0x90   :  { %v112_v14 = vpop.xlane.xlu0 %111  ;;  %v118_v15 = vpop.xlane.xlu1 %117 }
  0x91   :  { %v303_v30 = vmul.f32 0.03125, %v112_v14  ;;  %v305_v31 = vmul.f32 0.03125, %v118_v15 }
  0x93   :  { %v4327_v39 = vsub.f32 %v3937_v0, %v303_v30  ;;  %v4330_v38 = vsub.f32 %v3942_v1, %v305_v31 }
  0x94   :  { %v115_v46 = vpop.xlane.xlu0 %114  ;;  %v121_v47 = vpop.xlane.xlu1 %120 }
  0x95   :  { %5583 = vst [vmem:[#allocation13_spill] sm:$0xff] %v4330_v38  ;;  %v304_v24 = vmul.f32 0.03125, %v115_v46  ;;  %v306_v22 = vmul.f32 0.03125, %v121_v47  ;;  %v431_v54 = vmul.f32 %v4327_v39, %v4327_v39  ;;  %v433_v62 = vmul.f32 %v4330_v38, %v4330_v38 }
  0x97   :  { %v4337_v63 = vsub.f32 %v3947_v2, %v304_v24  ;;  %v4340_v14 = vsub.f32 %v3956_v5, %v306_v22  ;;  %v495_v0 = vsel %vm109_vm0, %v431_v54, 0.0  ;;  %v501_v30 = vsel %vm109_vm0, %v433_v62, 0.0 }
  0x98   :  { %496 = vadd.xlane.f32.xlu0 %v495_v0  ;;  %v124_v1 = vpop.xlane.xlu0 %123  ;;  %v127_v15 = vpop.xlane.xlu1 %126 }
  0x99   :  { %v307_v31 = vmul.f32 0.03125, %v124_v1  ;;  %v308_v46 = vmul.f32 0.03125, %v127_v15  ;;  %v432_v47 = vmul.f32 %v4337_v63, %v4337_v63  ;;  %v434_v38 = vmul.f32 %v4340_v14, %v4340_v14 }
  0x9b   :  { %v4349_v2 = vsub.f32 %v3965_v8, %v307_v31  ;;  %v4352_v5 = vsub.f32 %v3970_v9, %v308_v46  ;;  %v498_v22 = vsel %vm109_vm0, %v432_v47, 0.0  ;;  %v504_v62 = vsel %vm109_vm0, %v434_v38, 0.0 }
  0x9c   :  { %502 = vadd.xlane.f32.xlu0 %v501_v30  ;;  %499 = vadd.xlane.f32.xlu1 %v498_v22  ;;  %v130_v24 = vpop.xlane.xlu0 %129  ;;  %v133_v54 = vpop.xlane.xlu1 %132 }
  0x9d   :  { %v309_v0 = vmul.f32 0.03125, %v130_v24  ;;  %v310_v1 = vmul.f32 0.03125, %v133_v54  ;;  %v435_v15 = vmul.f32 %v4349_v2, %v4349_v2  ;;  %v436_v8 = vmul.f32 %v4352_v5, %v4352_v5 }
  0x9f   :  { %v4361_v31 = vsub.f32 %v3979_v12, %v309_v0  ;;  %v4364_v9 = vsub.f32 %v3984_v13, %v310_v1  ;;  %v507_v30 = vsel %vm109_vm0, %v435_v15, 0.0  ;;  %v510_v47 = vsel %vm109_vm0, %v436_v8, 0.0 }
  0xa0   :  { %505 = vadd.xlane.f32.xlu1 %v504_v62  ;;  %508 = vadd.xlane.f32.xlu0 %v507_v30  ;;  %v136_v46 = vpop.xlane.xlu0 %135  ;;  %v139_v38 = vpop.xlane.xlu1 %138 }
  0xa1   :  { %v311_v22 = vmul.f32 0.03125, %v136_v46  ;;  %v312_v24 = vmul.f32 0.03125, %v139_v38  ;;  %v437_v54 = vmul.f32 %v4361_v31, %v4361_v31  ;;  %v438_v12 = vmul.f32 %v4364_v9, %v4364_v9 }
  0xa3   :  { %v4373_v0 = vsub.f32 %v3993_v16, %v311_v22  ;;  %v4376_v13 = vsub.f32 %v3998_v17, %v312_v24  ;;  %v513_v62 = vsel %vm109_vm0, %v437_v54, 0.0  ;;  %v516_v8 = vsel %vm109_vm0, %v438_v12, 0.0 }
  0xa4   :  { %511 = vadd.xlane.f32.xlu1 %v510_v47  ;;  %514 = vadd.xlane.f32.xlu0 %v513_v62  ;;  %v142_v1 = vpop.xlane.xlu0 %141  ;;  %v145_v15 = vpop.xlane.xlu1 %144 }
  0xa5   :  { %v313_v30 = vmul.f32 0.03125, %v142_v1  ;;  %v314_v46 = vmul.f32 0.03125, %v145_v15  ;;  %v439_v38 = vmul.f32 %v4373_v0, %v4373_v0  ;;  %v440_v16 = vmul.f32 %v4376_v13, %v4376_v13 }
  0xa7   :  { %v4385_v22 = vsub.f32 %v4007_v20, %v313_v30  ;;  %v4388_v17 = vsub.f32 %v4012_v21, %v314_v46  ;;  %v519_v47 = vsel %vm109_vm0, %v439_v38, 0.0  ;;  %v522_v12 = vsel %vm109_vm0, %v440_v16, 0.0 }
  0xa8   :  { %517 = vadd.xlane.f32.xlu1 %v516_v8  ;;  %520 = vadd.xlane.f32.xlu0 %v519_v47  ;;  %v148_v24 = vpop.xlane.xlu0 %147  ;;  %v151_v54 = vpop.xlane.xlu1 %150 }
  0xa9   :  { %v315_v62 = vmul.f32 0.03125, %v148_v24  ;;  %v316_v1 = vmul.f32 0.03125, %v151_v54  ;;  %v441_v15 = vmul.f32 %v4385_v22, %v4385_v22  ;;  %v442_v20 = vmul.f32 %v4388_v17, %v4388_v17 }
  0xab   :  { %v4397_v30 = vsub.f32 %v4019_v23, %v315_v62  ;;  %v4400_v21 = vsub.f32 %v4026_v25, %v316_v1  ;;  %v525_v8 = vsel %vm109_vm0, %v441_v15, 0.0  ;;  %v528_v16 = vsel %vm109_vm0, %v442_v20, 0.0 }
  0xac   :  { %523 = vadd.xlane.f32.xlu1 %v522_v12  ;;  %526 = vadd.xlane.f32.xlu0 %v525_v8  ;;  %v154_v46 = vpop.xlane.xlu0 %153  ;;  %v157_v38 = vpop.xlane.xlu1 %156 }
  0xad   :  { %v317_v47 = vmul.f32 0.03125, %v154_v46  ;;  %v318_v24 = vmul.f32 0.03125, %v157_v38  ;;  %v443_v54 = vmul.f32 %v4397_v30, %v4397_v30  ;;  %v444_v23 = vmul.f32 %v4400_v21, %v4400_v21 }
  0xaf   :  { %v4409_v62 = vsub.f32 %v4035_v28, %v317_v47  ;;  %v4412_v25 = vsub.f32 %v4040_v29, %v318_v24  ;;  %v531_v12 = vsel %vm109_vm0, %v443_v54, 0.0  ;;  %v534_v20 = vsel %vm109_vm0, %v444_v23, 0.0 }
  0xb0   :  { %529 = vadd.xlane.f32.xlu1 %v528_v16  ;;  %532 = vadd.xlane.f32.xlu0 %v531_v12  ;;  %v160_v1 = vpop.xlane.xlu0 %159  ;;  %v163_v15 = vpop.xlane.xlu1 %162 }
  0xb1   :  { %5584 = vst [vmem:[#allocation14_spill] sm:$0xff] %v4409_v62  ;;  %5585 = vst [vmem:[#allocation15_spill] sm:$0xff] %v4412_v25  ;;  %v319_v8 = vmul.f32 0.03125, %v160_v1  ;;  %v320_v46 = vmul.f32 0.03125, %v163_v15  ;;  %v445_v38 = vmul.f32 %v4409_v62, %v4409_v62  ;;  %v446_v28 = vmul.f32 %v4412_v25, %v4412_v25 }
  0xb3   :  { %v4421_v47 = vsub.f32 %v4049_v32, %v319_v8  ;;  %v4424_v29 = vsub.f32 %v4054_v33, %v320_v46  ;;  %v537_v16 = vsel %vm109_vm0, %v445_v38, 0.0  ;;  %v540_v23 = vsel %vm109_vm0, %v446_v28, 0.0  ;;  %v3681_v28 = vld [vmem:[%s5530_s2] sm:$0xff]  }
  0xb4   :  { %535 = vadd.xlane.f32.xlu1 %v534_v20  ;;  %538 = vadd.xlane.f32.xlu0 %v537_v16  ;;  %v166_v24 = vpop.xlane.xlu0 %165  ;;  %v169_v54 = vpop.xlane.xlu1 %168  ;;  %v3682_v16 = vld [vmem:[%s5530_s2 + $0x10] sm:$0xff]  }
  0xb5   :  { %5586 = vst [vmem:[#allocation16_spill] sm:$0xff] %v4421_v47  ;;  %5587 = vst [vmem:[#allocation17_spill] sm:$0xff] %v4424_v29  ;;  %v321_v12 = vmul.f32 0.03125, %v166_v24  ;;  %v322_v1 = vmul.f32 0.03125, %v169_v54  ;;  %v447_v15 = vmul.f32 %v4421_v47, %v4421_v47  ;;  %v448_v32 = vmul.f32 %v4424_v29, %v4424_v29  ;;  %v4453_v54 = vld [vmem:[%s5529_s1 + $0x1c0] sm:$0xff]  ;;  %3302 = vmatprep.subr.bf16.mxu0 %v3681_v28 }
  0xb6   :  { %3370 = vmatprep.subr.bf16.mxu1 %v3682_v16  ;;  %3303 = vmatpush3.bf16.msra.mxu0 %v3681_v28 }
  0xb7   :  { %v4433_v8 = vsub.f32 %v4063_v36, %v321_v12  ;;  %v4436_v33 = vsub.f32 %v4068_v37, %v322_v1  ;;  %v543_v20 = vsel %vm109_vm0, %v447_v15, 0.0  ;;  %v546_v36 = vsel %vm109_vm0, %v448_v32, 0.0  ;;  %3371 = vmatpush3.bf16.msra.mxu1 %v3682_v16 }
  0xb8   :  { %541 = vadd.xlane.f32.xlu1 %v540_v23  ;;  %544 = vadd.xlane.f32.xlu0 %v543_v20  ;;  %v172_v46 = vpop.xlane.xlu0 %171  ;;  %v175_v38 = vpop.xlane.xlu1 %174  ;;  %v278_v1 = vsel %vm109_vm0, %v4453_v54, 0.0  ;;  %v3683_v20 = vld [vmem:[%s5530_s2 + $0x8] sm:$0xff]  }
  0xb9   :  { %5588 = vst [vmem:[#allocation18_spill] sm:$0xff] %v4433_v8  ;;  %5589 = vst [vmem:[#allocation19_spill] sm:$0xff] %v4436_v33  ;;  %v449_v37 = vmul.f32 %v4433_v8, %v4433_v8  ;;  %v450_v24 = vmul.f32 %v4436_v33, %v4436_v33  ;;  %v323_v23 = vmul.f32 0.03125, %v172_v46  ;;  %v3684_v46 = vld [vmem:[%s5530_s2 + $0x18] sm:$0xff]   ;;  %v324_v16 = vmul.f32 0.03125, %v175_v38  ;;  %3304 = vmatprep.subr.bf16.mxu0 %v3683_v20 }
  0xba   :  { %3372 = vmatprep.subr.bf16.mxu1 %v3684_v46  ;;  %3305 = vmatpush3.bf16.msra.mxu0 %v3683_v20 }
  0xbb   :  { %v549_v12 = vsel %vm109_vm0, %v449_v37, 0.0  ;;  %v552_v33 = vsel %vm109_vm0, %v450_v24, 0.0  ;;  %v4466_v28 = vsub.f32 %v4077_v40, %v323_v23  ;;  %v4476_v37 = vld [vmem:[%s5529_s1 + $0x1d0] sm:$0xff]  ;;  %3373 = vmatpush3.bf16.msra.mxu1 %v3684_v46  ;;  %v4483_v8 = vsub.f32 %v4082_v41, %v324_v16 }
  0xbc   :  { %547 = vadd.xlane.f32.xlu1 %v546_v36  ;;  %550 = vadd.xlane.f32.xlu0 %v549_v12  ;;  %v178_v15 = vpop.xlane.xlu0 %177  ;;  %v181_v32 = vpop.xlane.xlu1 %180  ;;  %v4471_v36 = vld [vmem:[%s5529_s1 + $0x1c8] sm:$0xff]  ;;  %5592 = vst [vmem:[#allocation22_spill] sm:$0xff] %v4476_v37  ;;  %v284_v38 = vsel %vm109_vm0, %v4476_v37, 0.0 }
  0xbd   :  { %5590 = vst [vmem:[#allocation20_spill] sm:$0xff] %v4466_v28  ;;  %5591 = vst [vmem:[#allocation21_spill] sm:$0xff] %v4471_v36  ;;  %v325_v12 = vmul.f32 0.03125, %v178_v15  ;;  %v281_v40 = vsel %vm109_vm0, %v4471_v36, 0.0  ;;  %v326_v15 = vmul.f32 0.03125, %v181_v32  ;;  %v452_v32 = vmul.f32 %v4483_v8, %v4483_v8 }
  0xbe   :  { %5593 = vst [vmem:[#allocation23_spill] sm:$0xff] %v4483_v8 }
  0xbf   :  { %v4486_v29 = vsub.f32 %v4091_v44, %v325_v12  ;;  %v4498_v16 = vsub.f32 %v4096_v45, %v326_v15  ;;  %v4512_v15 = vld [vmem:[%s5529_s1 + $0x1e0] sm:$0xff] }
  0xc0   :  { %553 = vadd.xlane.f32.xlu1 %v552_v33  ;;  %279 = vadd.xlane.f32.xlu0 %v278_v1  ;;  %v187_v24 = vpop.xlane.xlu1 %186  ;;  %v184_v23 = vpop.xlane.xlu0 %183  ;;  %v4491_v33 = vld [vmem:[%s5529_s1 + $0x1d8] sm:$0xff]  ;;  %v451_v1 = vmul.f32 %v4466_v28, %v4466_v28  ;;  %v558_v28 = vsel %vm109_vm0, %v452_v32, 0.0  ;;  %5597 = vst [vmem:[#allocation27_spill] sm:$0xff] %v4512_v15  ;;  %v290_v32 = vsel %vm109_vm0, %v4512_v15, 0.0 }
  0xc1   :  { %5594 = vst [vmem:[#allocation24_spill] sm:$0xff] %v4486_v29  ;;  %5595 = vst [vmem:[#allocation25_spill] sm:$0xff] %v4491_v33  ;;  %v287_v20 = vsel %vm109_vm0, %v4491_v33, 0.0  ;;  %v453_v12 = vmul.f32 %v4486_v29, %v4486_v29  ;;  %v454_v45 = vmul.f32 %v4498_v16, %v4498_v16  ;;  %v327_v29 = vmul.f32 0.03125, %v184_v23 }
  0xc2   :  { %5596 = vst [vmem:[#allocation26_spill] sm:$0xff] %v4498_v16  ;;  %v555_v44 = vsel %vm109_vm0, %v451_v1, 0.0  ;;  %v328_v1 = vmul.f32 0.03125, %v187_v24  ;;  %v4525_v16 = vld [vmem:[%s5529_s1 + $0x1f0] sm:$0xff] }
  0xc3   :  { %v561_v47 = vsel %vm109_vm0, %v453_v12, 0.0  ;;  %v564_v8 = vsel %vm109_vm0, %v454_v45, 0.0  ;;  %v4520_v12 = vld [vmem:[%s5529_s1 + $0x1e8] sm:$0xff]  ;;  %v4541_v23 = vsub.f32 %v4110_v49, %v327_v29  ;;  %v296_v37 = vsel %vm109_vm0, %v4525_v16, 0.0 }
  0xc4   :  { %282 = vadd.xlane.f32.xlu1 %v281_v40  ;;  %285 = vadd.xlane.f32.xlu0 %v284_v38  ;;  %v193_v46 = vpop.xlane.xlu1 %192  ;;  %v190_v41 = vpop.xlane.xlu0 %189  ;;  %v4538_v24 = vsub.f32 %v4105_v48, %v328_v1  ;;  %v293_v62 = vsel %vm109_vm0, %v4520_v12, 0.0  ;;  %v4552_v48 = vld [vmem:[%s5529_s1 + $0x1f8] sm:$0xff] }
  0xc5   :  { %5601 = vst [vmem:[#allocation31_spill] sm:$0xff] %v4541_v23  ;;  %v330_v45 = vmul.f32 0.03125, %v193_v46  ;;  %v329_v15 = vmul.f32 0.03125, %v190_v41  ;;  %5602 = vst [vmem:[#allocation32_spill] sm:$0xff] %v4552_v48  ;;  %v455_v46 = vmul.f32 %v4541_v23, %v4541_v23 }
  0xc6   :  { %5600 = vst [vmem:[#allocation30_spill] sm:$0xff] %v4538_v24  ;;  %v456_v49 = vmul.f32 %v4538_v24, %v4538_v24 }
  0xc7   :  { %v4557_v29 = vsub.f32 %v4119_v52, %v330_v45 }
  0xc8   :  { %288 = vadd.xlane.f32.xlu1 %v287_v20  ;;  %556 = vadd.xlane.f32.xlu0 %v555_v44  ;;  %v199_v40 = vpop.xlane.xlu1 %198  ;;  %v196_v38 = vpop.xlane.xlu0 %195  ;;  %v570_v52 = vsel %vm109_vm0, %v456_v49, 0.0 }
  0xc9   :  { %5603 = vst [vmem:[#allocation33_spill] sm:$0xff] %v4557_v29  ;;  %v331_v24 = vmul.f32 0.03125, %v196_v38 }
  0xcc   :  { %559 = vadd.xlane.f32.xlu1 %v558_v28  ;;  %562 = vadd.xlane.f32.xlu0 %v561_v47  ;;  %v205_v20 = vpop.xlane.xlu1 %204  ;;  %v202_v44 = vpop.xlane.xlu0 %201  ;;  %v4530_v47 = vld [vmem:[%s5528_s0] sm:$0xf]  ;;  %v4535_v28 = vld [vmem:[%s5528_s0 + $0x4] sm:$0xf] }
  0xcd   :  { %5598 = vst [vmem:[#allocation28_spill] sm:$0xff] %v4530_v47  ;;  %5599 = vst [vmem:[#allocation29_spill] sm:$0xff] %v4535_v28  ;;  %v1677_v36 = vcombine.low %v4530_v47, %v4535_v28  ;;  %v332_v47 = vmul.f32 0.03125, %v199_v40  ;;  %v334_v40 = vmul.f32 0.03125, %v205_v20  ;;  %v333_v38 = vmul.f32 0.03125, %v202_v44 }
  0xcf   :  { %v1679_v28 = vsel %vm109_vm0, %v1677_v36, 0.0  ;;  %v4574_v23 = vsub.f32 %v4133_v56, %v332_v47  ;;  %v4577_v36 = vsub.f32 %v4138_v57, %v331_v24  ;;  %v4585_v56 = vsub.f32 %v4152_v61, %v333_v38 }
  0xd0   :  { %565 = vadd.xlane.f32.xlu1 %v564_v8  ;;  %291 = vadd.xlane.f32.xlu0 %v290_v32  ;;  %v211_v33 = vpop.xlane.xlu1 %210  ;;  %v208_v25 = vpop.xlane.xlu0 %207  ;;  %v4560_v8 = vsub.f32 %v4124_v53, %v329_v15  ;;  %v299_v32 = vsel %vm109_vm0, %v4552_v48, 0.0  ;;  %v458_v53 = vmul.f32 %v4557_v29, %v4557_v29  ;;  %v4582_v48 = vsub.f32 %v4147_v60, %v334_v40 }
  0xd1   :  { %v460_v57 = vmul.f32 %v4574_v23, %v4574_v23 }
  0xd2   :  { %5604 = vst [vmem:[#allocation34_spill] sm:$0xff] %v4560_v8  ;;  %v576_v49 = vsel %vm109_vm0, %v458_v53, 0.0 }
  0xd3   :  { %v582_v61 = vsel %vm109_vm0, %v460_v57, 0.0 }
  0xd4   :  { %294 = vadd.xlane.f32.xlu1 %v293_v62  ;;  %297 = vadd.xlane.f32.xlu0 %v296_v37  ;;  %v217_v41 = vpop.xlane.xlu1 %216  ;;  %v214_v1 = vpop.xlane.xlu0 %213  ;;  %v567_v62 = vsel %vm109_vm0, %v455_v46, 0.0  ;;  %v457_v37 = vmul.f32 %v4560_v8, %v4560_v8 }
  0xd5   :  { %v338_v44 = vmul.f32 0.03125, %v217_v41  ;;  %v337_v60 = vmul.f32 0.03125, %v214_v1 }
  0xd6   :  { %v573_v46 = vsel %vm109_vm0, %v457_v37, 0.0 }
  0xd7   :  { %v4609_v41 = vsub.f32 %v4180_v11, %v337_v60 }
  0xd8   :  { %300 = vadd.xlane.f32.xlu1 %v299_v32  ;;  %1680 = vadd.xlane.f32.xlu0 %v1679_v28  ;;  %v223_v15 = vpop.xlane.xlu1 %222  ;;  %v220_v45 = vpop.xlane.xlu0 %219  ;;  %v336_v28 = vmul.f32 0.03125, %v211_v33  ;;  %v335_v32 = vmul.f32 0.03125, %v208_v25  ;;  %v459_v33 = vmul.f32 %v4577_v36, %v4577_v36 }
  0xd9   :  { %v465_v57 = vmul.f32 %v4609_v41, %v4609_v41 }
  0xda   :  { %v4592_v20 = vsub.f32 %v4161_v3, %v336_v28  ;;  %v4595_v25 = vsub.f32 %v4166_v4, %v335_v32  ;;  %v461_v3 = vmul.f32 %v4585_v56, %v4585_v56  ;;  %v4606_v4 = vsub.f32 %v4175_v10, %v338_v44 }
  0xdc   :  { %571 = vadd.xlane.f32.xlu0 %v570_v52  ;;  %568 = vadd.xlane.f32.xlu1 %v567_v62  ;;  %v229_v29 = vpop.xlane.xlu1 %228  ;;  %v226_v8 = vpop.xlane.xlu0 %225  ;;  %v579_v52 = vsel %vm109_vm0, %v459_v33, 0.0  ;;  %v462_v62 = vmul.f32 %v4582_v48, %v4582_v48  ;;  %v464_v53 = vmul.f32 %v4592_v20, %v4592_v20  ;;  %v463_v1 = vmul.f32 %v4595_v25, %v4595_v25 }
  0xdd   :  { %v585_v28 = vsel %vm109_vm0, %v461_v3, 0.0  ;;  %v466_v11 = vmul.f32 %v4606_v4, %v4606_v4  ;;  %v597_v3 = vsel %vm109_vm0, %v465_v57, 0.0 }
  0xde   :  { %v588_v38 = vsel %vm109_vm0, %v462_v62, 0.0  ;;  %v594_v32 = vsel %vm109_vm0, %v464_v53, 0.0  ;;  %v591_v10 = vsel %vm109_vm0, %v463_v1, 0.0 }
  0xdf   :  { %v600_v62 = vsel %vm109_vm0, %v466_v11, 0.0 }
  0xe0   :  { %577 = vadd.xlane.f32.xlu0 %v576_v49  ;;  %574 = vadd.xlane.f32.xlu1 %v573_v46  ;;  %v235_v47 = vpop.xlane.xlu1 %234  ;;  %v232_v24 = vpop.xlane.xlu0 %231  ;;  %v340_v49 = vmul.f32 0.03125, %v223_v15  ;;  %v339_v46 = vmul.f32 0.03125, %v220_v45  ;;  %v342_v45 = vmul.f32 0.03125, %v229_v29 }
  0xe1   :  { %v343_v53 = vmul.f32 0.03125, %v232_v24 }
  0xe2   :  { %v4622_v60 = vsub.f32 %v4189_v18, %v340_v49  ;;  %v4625_v15 = vsub.f32 %v4194_v19, %v339_v46  ;;  %v4630_v1 = vsub.f32 %v4203_v26, %v342_v45 }
  0xe3   :  { %v4643_v24 = vsub.f32 %v4222_v35, %v343_v53 }
  0xe4   :  { %583 = vadd.xlane.f32.xlu0 %v582_v61  ;;  %580 = vadd.xlane.f32.xlu1 %v579_v52  ;;  %v241_v37 = vpop.xlane.xlu1 %240  ;;  %v238_v40 = vpop.xlane.xlu0 %237  ;;  %v341_v61 = vmul.f32 0.03125, %v226_v8  ;;  %v344_v52 = vmul.f32 0.03125, %v235_v47  ;;  %v468_v18 = vmul.f32 %v4622_v60, %v4622_v60  ;;  %v467_v19 = vmul.f32 %v4625_v15, %v4625_v15 }
  0xe5   :  { %v346_v26 = vmul.f32 0.03125, %v241_v37  ;;  %v470_v46 = vmul.f32 %v4630_v1, %v4630_v1 }
  0xe6   :  { %v4640_v47 = vsub.f32 %v4217_v34, %v344_v52  ;;  %v603_v49 = vsel %vm109_vm0, %v467_v19, 0.0 }
  0xe7   :  { %v4654_v35 = vsub.f32 %v4231_v42, %v346_v26  ;;  %v612_v57 = vsel %vm109_vm0, %v470_v46, 0.0 }
  0xe8   :  { %589 = vadd.xlane.f32.xlu0 %v588_v38  ;;  %586 = vadd.xlane.f32.xlu1 %v585_v28  ;;  %v247_v33 = vpop.xlane.xlu1 %246  ;;  %v244_v44 = vpop.xlane.xlu0 %243  ;;  %v4633_v38 = vsub.f32 %v4208_v27, %v341_v61  ;;  %v345_v28 = vmul.f32 0.03125, %v238_v40  ;;  %v606_v27 = vsel %vm109_vm0, %v468_v18, 0.0  ;;  %v472_v34 = vmul.f32 %v4640_v47, %v4640_v47 }
  0xe9   :  { %v471_v40 = vmul.f32 %v4643_v24, %v4643_v24  ;;  %v348_v61 = vmul.f32 0.03125, %v247_v33  ;;  %v347_v52 = vmul.f32 0.03125, %v244_v44 }
  0xea   :  { %v4657_v37 = vsub.f32 %v4236_v43, %v345_v28  ;;  %v474_v43 = vmul.f32 %v4654_v35, %v4654_v35 }
  0xeb   :  { %v615_v42 = vsel %vm109_vm0, %v471_v40, 0.0  ;;  %v4670_v53 = vsub.f32 %v4245_v50, %v348_v61  ;;  %v4673_v18 = vsub.f32 %v4250_v51, %v347_v52 }
  0xec   :  { %595 = vadd.xlane.f32.xlu0 %v594_v32  ;;  %592 = vadd.xlane.f32.xlu1 %v591_v10  ;;  %v253_v29 = vpop.xlane.xlu1 %252  ;;  %v250_v8 = vpop.xlane.xlu0 %249  ;;  %v469_v32 = vmul.f32 %v4633_v38, %v4633_v38 }
  0xed   :  { %v350_v33 = vmul.f32 0.03125, %v253_v29  ;;  %v349_v44 = vmul.f32 0.03125, %v250_v8  ;;  %v476_v51 = vmul.f32 %v4670_v53, %v4670_v53  ;;  %v475_v29 = vmul.f32 %v4673_v18, %v4673_v18 }
  0xee   :  { %v609_v45 = vsel %vm109_vm0, %v469_v32, 0.0 }
  0xef   :  { %v4678_v32 = vsub.f32 %v4259_v58, %v350_v33  ;;  %v4681_v50 = vsub.f32 %v4264_v59, %v349_v44  ;;  %v630_v59 = vsel %vm109_vm0, %v476_v51, 0.0 }
  0xf0   :  { %601 = vadd.xlane.f32.xlu0 %v600_v62  ;;  %598 = vadd.xlane.f32.xlu1 %v597_v3  ;;  %v259_v10 = vpop.xlane.xlu1 %258  ;;  %v256_v11 = vpop.xlane.xlu0 %255  ;;  %v618_v62 = vsel %vm109_vm0, %v472_v34, 0.0  ;;  %v473_v3 = vmul.f32 %v4657_v37, %v4657_v37 }
  0xf1   :  { %v352_v28 = vmul.f32 0.03125, %v259_v10  ;;  %v351_v46 = vmul.f32 0.03125, %v256_v11 }
  0xf3   :  { %v4688_v8 = vsub.f32 %v4273_v6, %v352_v28  ;;  %v4691_v34 = vsub.f32 %v4278_v7, %v351_v46  ;;  %v477_v6 = vmul.f32 %v4681_v50, %v4681_v50  ;;  %v5605_v7 = vld [vmem:[#allocation8_spill] sm:$0xff] }
  0xf4   :  { %607 = vadd.xlane.f32.xlu0 %v606_v27  ;;  %604 = vadd.xlane.f32.xlu1 %v603_v49  ;;  %v265_v19 = vpop.xlane.xlu1 %264  ;;  %v262_v26 = vpop.xlane.xlu0 %261  ;;  %v624_v27 = vsel %vm109_vm0, %v474_v43, 0.0  ;;  %v621_v49 = vsel %vm109_vm0, %v473_v3, 0.0 }
  0xf5   :  { %v354_v40 = vmul.f32 0.03125, %v265_v19  ;;  %v353_v58 = vmul.f32 0.03125, %v262_v26  ;;  %v480_v61 = vmul.f32 %v4688_v8, %v4688_v8  ;;  %v479_v43 = vmul.f32 %v4691_v34, %v4691_v34 }
  0xf6   :  { %v633_v33 = vsel %vm109_vm0, %v477_v6, 0.0  ;;  %v5609_v6 = vld [vmem:[#allocation12_spill] sm:$0xff] }
  0xf7   :  { %v4702_v52 = vsub.f32 %v5605_v7, %v354_v40 }
  0xf8   :  { %613 = vadd.xlane.f32.xlu0 %v612_v57  ;;  %610 = vadd.xlane.f32.xlu1 %v609_v45  ;;  %v271_v10 = vpop.xlane.xlu1 %270  ;;  %v268_v11 = vpop.xlane.xlu0 %267  ;;  %v627_v57 = vsel %vm109_vm0, %v475_v29, 0.0  ;;  %v478_v45 = vmul.f32 %v4678_v32, %v4678_v32  ;;  %v5607_v29 = vld [vmem:[#allocation10_spill] sm:$0xff] }
  0xf9   :  { %v356_v44 = vmul.f32 0.03125, %v271_v10  ;;  %v355_v19 = vmul.f32 0.03125, %v268_v11  ;;  %v482_v46 = vmul.f32 %v4702_v52, %v4702_v52 }
  0xfa   :  { %v636_v3 = vsel %vm109_vm0, %v478_v45, 0.0 }
  0xfb   :  { %v4718_v40 = vsub.f32 %v5607_v29, %v356_v44 }
  0xfc   :  { %619 = vadd.xlane.f32.xlu0 %v618_v62  ;;  %616 = vadd.xlane.f32.xlu1 %v615_v42  ;;  %v5606_v62 = vld [vmem:[#allocation9_spill] sm:$0xff]  ;;  %v277_v26 = vpop.xlane.xlu1 %276  ;;  %v274_v28 = vpop.xlane.xlu0 %273 }
  0xfd   :  { %v4705_v42 = vsub.f32 %v5606_v62, %v353_v58  ;;  %v5608_v58 = vld [vmem:[#allocation11_spill] sm:$0xff]  ;;  %v358_v11 = vmul.f32 0.03125, %v277_v26  ;;  %v484_v62 = vmul.f32 %v4718_v40, %v4718_v40 }
  0xfe   :  { %v4721_v10 = vsub.f32 %v5608_v58, %v355_v19 }
  0xff   :  { %v481_v51 = vmul.f32 %v4705_v42, %v4705_v42 }
 0x100   :  { %625 = vadd.xlane.f32.xlu0 %v624_v27  ;;  %622 = vadd.xlane.f32.xlu1 %v621_v49  ;;  %v642_v27 = vsel %vm109_vm0, %v480_v61, 0.0  ;;  %v639_v49 = vsel %vm109_vm0, %v479_v43, 0.0  ;;  %v4726_v61 = vsub.f32 %v5609_v6, %v358_v11  ;;  %v483_v43 = vmul.f32 %v4721_v10, %v4721_v10 }
 0x101   :  { %v645_v45 = vsel %vm109_vm0, %v481_v51, 0.0 }
 0x102   :  { %v486_v44 = vmul.f32 %v4726_v61, %v4726_v61 }
 0x104   :  { %631 = vadd.xlane.f32.xlu0 %v630_v59  ;;  %628 = vadd.xlane.f32.xlu1 %v627_v57  ;;  %v357_v59 = vmul.f32 0.03125, %v274_v28  ;;  %v648_v57 = vsel %vm109_vm0, %v482_v46, 0.0  ;;  %v5563_v28 = vmov 0.0|0.0  }
 0x105   :  { %3491 = vmatprep.subr.bf16.mxu0 %v5563_v28 }
 0x106   :  { %v4729_v7 = vsub.f32 %v4320_v55, %v357_v59  ;;  %v660_v55 = vsel %vm109_vm0, %v486_v44, 0.0 }
 0x108   :  { %637 = vadd.xlane.f32.xlu0 %v636_v3  ;;  %634 = vadd.xlane.f32.xlu1 %v633_v33  ;;  %v654_v3 = vsel %vm109_vm0, %v484_v62, 0.0  ;;  %v651_v33 = vsel %vm109_vm0, %v483_v43, 0.0  ;;  %v485_v19 = vmul.f32 %v4729_v7, %v4729_v7 }
 0x10a   :  { %v657_v26 = vsel %vm109_vm0, %v485_v19, 0.0 }
 0x10c   :  { %643 = vadd.xlane.f32.xlu0 %v642_v27  ;;  %640 = vadd.xlane.f32.xlu1 %v639_v49 }
 0x110   :  { %649 = vadd.xlane.f32.xlu0 %v648_v57  ;;  %646 = vadd.xlane.f32.xlu1 %v645_v45 }
 0x114   :  { %655 = vadd.xlane.f32.xlu0 %v654_v3  ;;  %652 = vadd.xlane.f32.xlu1 %v651_v33 }
 0x118   :  { %661 = vadd.xlane.f32.xlu0 %v660_v55  ;;  %658 = vadd.xlane.f32.xlu1 %v657_v26 }
 0x125   :  { %v497_v27 = vpop.xlane.xlu0 %496 }
 0x126   :  { %v687_v49 = vmul.f32 0.03125, %v497_v27 }
 0x128   :  { %v751_v46 = vadd.f32 1e-05, %v687_v49 }
 0x129   :  { %v500_v51 = vpop.xlane.xlu1 %499  ;;  %v503_v29 = vpop.xlane.xlu0 %502 }
 0x12a   :  { %v688_v58 = vmul.f32 0.03125, %v500_v51  ;;  %v689_v11 = vmul.f32 0.03125, %v503_v29  ;;  %3685 = vrsqrt.f32 %v751_v46 }
 0x12c   :  { %v752_v59 = vadd.f32 1e-05, %v688_v58  ;;  %v753_v57 = vadd.f32 1e-05, %v689_v11 }
 0x12d   :  { %v506_v45 = vpop.xlane.xlu1 %505  ;;  %v509_v6 = vpop.xlane.xlu0 %508 }
 0x12e   :  { %3687 = vrsqrt.f32 %v752_v59  ;;  %v690_v62 = vmul.f32 0.03125, %v506_v45  ;;  %v691_v43 = vmul.f32 0.03125, %v509_v6 }
 0x12f   :  { %3689 = vrsqrt.f32 %v753_v57 }
 0x130   :  { %v754_v3 = vadd.f32 1e-05, %v690_v62  ;;  %v755_v33 = vadd.f32 1e-05, %v691_v43 }
 0x131   :  { %v512_v44 = vpop.xlane.xlu1 %511  ;;  %v515_v19 = vpop.xlane.xlu0 %514 }
 0x132   :  { %3691 = vrsqrt.f32 %v754_v3  ;;  %v692_v55 = vmul.f32 0.03125, %v512_v44  ;;  %v693_v26 = vmul.f32 0.03125, %v515_v19 }
 0x133   :  { %3693 = vrsqrt.f32 %v755_v33 }
 0x134   :  { %v756_v27 = vadd.f32 1e-05, %v692_v55  ;;  %v757_v49 = vadd.f32 1e-05, %v693_v26  ;;  %v3686_v29 = vpop.eup %3685  ;;  %v31_v26 = vld [vmem:[%s5531_s3] sm:$0xff] }
 0x135   :  { %v518_v51 = vpop.xlane.xlu1 %517  ;;  %v521_v46 = vpop.xlane.xlu0 %520  ;;  %v879_v43 = vmul.f32 %v3686_v29, %v4327_v39  ;;  %v5610_v29 = vld [vmem:[#allocation13_spill] sm:$0xff] }
 0x136   :  { %3695 = vrsqrt.f32 %v756_v27  ;;  %v694_v58 = vmul.f32 0.03125, %v518_v51  ;;  %v695_v11 = vmul.f32 0.03125, %v521_v46  ;;  %v32_v27 = vld [vmem:[%s5531_s3 + $0x8] sm:$0xff] }
 0x137   :  { %3697 = vrsqrt.f32 %v757_v49 }
 0x138   :  { %v3688_v59 = vpop.eup %3687  ;;  %v758_v45 = vadd.f32 1e-05, %v694_v58  ;;  %v759_v57 = vadd.f32 1e-05, %v695_v11 }
 0x139   :  { %v524_v6 = vpop.xlane.xlu1 %523  ;;  %v527_v62 = vpop.xlane.xlu0 %526  ;;  %v880_v3 = vmul.f32 %v3688_v59, %v4337_v63 }
 0x13a   :  { %v3690_v44 = vpop.eup %3689  ;;  %3699 = vrsqrt.f32 %v758_v45  ;;  %v696_v33 = vmul.f32 0.03125, %v524_v6  ;;  %v697_v19 = vmul.f32 0.03125, %v527_v62  ;;  %v3492_v62 = vpack.c.bf16 %v32_v27, %v31_v26 }
 0x13b   :  { %v943_v55 = vpack.c.bf16 %v880_v3, %v879_v43  ;;  %3701 = vrsqrt.f32 %v759_v57  ;;  %v881_v58 = vmul.f32 %v3690_v44, %v5610_v29  ;;  %v33_v57 = vld [vmem:[%s5531_s3 + $0x10] sm:$0xff]  ;;  %v34_v3 = vld [vmem:[%s5531_s3 + $0x18] sm:$0xff] }
 0x13c   :  { %v3692_v49 = vpop.eup %3691  ;;  %v760_v51 = vadd.f32 1e-05, %v696_v33  ;;  %v761_v46 = vadd.f32 1e-05, %v697_v19 }
 0x13d   :  { %v530_v39 = vpop.xlane.xlu1 %529  ;;  %3306 = vmatprep.mubr.msk.bf16.mxu0 %vm109_vm0, %v943_v55  ;;  %3374 = vmatprep.mubr.msk.bf16.mxu1 %vm109_vm0, %v943_v55  ;;  %v533_v63 = vpop.xlane.xlu0 %532  ;;  %v882_v11 = vmul.f32 %v3692_v49, %v4340_v14 }
 0x13e   :  { %v3694_v59 = vpop.eup %3693  ;;  %3703 = vrsqrt.f32 %v760_v51  ;;  %v698_v45 = vmul.f32 0.03125, %v530_v39  ;;  %v699_v6 = vmul.f32 0.03125, %v533_v63  ;;  %v3495_v63 = vpack.c.bf16 %v34_v3, %v33_v57 }
 0x13f   :  { %v944_v43 = vpack.c.bf16 %v882_v11, %v881_v58  ;;  %3705 = vrsqrt.f32 %v761_v46  ;;  %v883_v26 = vmul.f32 %v3694_v59, %v4349_v2 }
 0x140   :  { %v3696_v33 = vpop.eup %3695  ;;  %v762_v19 = vadd.f32 1e-05, %v698_v45  ;;  %v763_v44 = vadd.f32 1e-05, %v699_v6 }
 0x141   :  { %v536_v55 = vpop.xlane.xlu1 %535  ;;  %v539_v14 = vpop.xlane.xlu0 %538  ;;  %3307 = vmatmul.mubr.msk.bf16.vlgmr.msra.gmra.mrb[0].mxu0 %vm109_vm0, %v944_v43  ;;  %3375 = vmatmul.mubr.msk.bf16.vlgmr.msra.gmra.mrb[0].mxu1 %vm109_vm0, %v944_v43  ;;  %v884_v27 = vmul.f32 %v3696_v33, %v4352_v5 }
 0x142   :  { %v3698_v49 = vpop.eup %3697  ;;  %3707 = vrsqrt.f32 %v762_v19  ;;  %v700_v51 = vmul.f32 0.03125, %v536_v55  ;;  %v701_v39 = vmul.f32 0.03125, %v539_v14  ;;  %3493 = vmatpush3.bf16.msra.mxu0 %v3492_v62 }
 0x143   :  { %v945_v29 = vpack.c.bf16 %v884_v27, %v883_v26  ;;  %3494 = vmatprep.subr.bf16.mxu0 %v5563_v28  ;;  %3709 = vrsqrt.f32 %v763_v44  ;;  %v885_v2 = vmul.f32 %v3698_v49, %v4361_v31 }
 0x144   :  { %v3700_v46 = vpop.eup %3699  ;;  %v764_v58 = vadd.f32 1e-05, %v700_v51  ;;  %v765_v11 = vadd.f32 1e-05, %v701_v39 }
 0x145   :  { %v542_v45 = vpop.xlane.xlu1 %541  ;;  %v545_v6 = vpop.xlane.xlu0 %544  ;;  %3310 = vmatprep.mubr.msk.bf16.mxu0 %vm109_vm0, %v945_v29  ;;  %3378 = vmatprep.mubr.msk.bf16.mxu1 %vm109_vm0, %v945_v29  ;;  %v886_v5 = vmul.f32 %v3700_v46, %v4364_v9 }
 0x146   :  { %v3702_v59 = vpop.eup %3701  ;;  %3711 = vrsqrt.f32 %v764_v58  ;;  %v702_v62 = vmul.f32 0.03125, %v542_v45  ;;  %v703_v43 = vmul.f32 0.03125, %v545_v6  ;;  %3496 = vmatpush3.bf16.msra.mxu0 %v3495_v63 }
 0x147   :  { %v946_v57 = vpack.c.bf16 %v886_v5, %v885_v2  ;;  %3713 = vrsqrt.f32 %v765_v11  ;;  %v887_v31 = vmul.f32 %v3702_v59, %v4373_v0 }
 0x148   :  { %v3704_v3 = vpop.eup %3703  ;;  %v766_v33 = vadd.f32 1e-05, %v702_v62  ;;  %v767_v19 = vadd.f32 1e-05, %v703_v43 }
 0x149   :  { %v548_v44 = vpop.xlane.xlu1 %547  ;;  %v551_v55 = vpop.xlane.xlu0 %550  ;;  %3311 = vmatmul.mubr.msk.bf16.gmra.mrb[4].mxu0 %vm109_vm0, %v946_v57  ;;  %3379 = vmatmul.mubr.msk.bf16.gmra.mrb[4].mxu1 %vm109_vm0, %v946_v57  ;;  %v888_v9 = vmul.f32 %v3704_v3, %v4376_v13 }
 0x14a   :  { %v3706_v14 = vpop.eup %3705  ;;  %3715 = vrsqrt.f32 %v766_v33  ;;  %v704_v26 = vmul.f32 0.03125, %v548_v44  ;;  %v705_v27 = vmul.f32 0.03125, %v551_v55  ;;  %v5611_v55 = vld [vmem:[#allocation21_spill] sm:$0xff] }
 0x14b   :  { %v947_v49 = vpack.c.bf16 %v888_v9, %v887_v31  ;;  %3717 = vrsqrt.f32 %v767_v19  ;;  %v889_v58 = vmul.f32 %v3706_v14, %v4385_v22  ;;  %v5612_v9 = vld [vmem:[#allocation22_spill] sm:$0xff] }
 0x14c   :  { %v3708_v51 = vpop.eup %3707  ;;  %v768_v39 = vadd.f32 1e-05, %v704_v26  ;;  %v769_v63 = vadd.f32 1e-05, %v705_v27  ;;  %v5613_v27 = vld [vmem:[#allocation14_spill] sm:$0xff] }
 0x14d   :  { %v554_v29 = vpop.xlane.xlu1 %553  ;;  %v280_v46 = vpop.xlane.xlu0 %279  ;;  %3314 = vmatprep.mubr.msk.bf16.mxu0 %vm109_vm0, %v947_v49  ;;  %3382 = vmatprep.mubr.msk.bf16.mxu1 %vm109_vm0, %v947_v49  ;;  %v890_v0 = vmul.f32 %v3708_v51, %v4388_v17  ;;  %v5614_v51 = vld [vmem:[#allocation15_spill] sm:$0xff] }
 0x14e   :  { %v3710_v13 = vpop.eup %3709  ;;  %3719 = vrsqrt.f32 %v768_v39  ;;  %v706_v11 = vmul.f32 0.03125, %v554_v29  ;;  %v359_v45 = vmul.f32 0.03125, %v280_v46 }
 0x14f   :  { %v948_v6 = vpack.c.bf16 %v890_v0, %v889_v58  ;;  %3721 = vrsqrt.f32 %v769_v63  ;;  %v891_v22 = vmul.f32 %v3710_v13, %v4397_v30 }
 0x150   :  { %v3712_v2 = vpop.eup %3711  ;;  %v770_v5 = vadd.f32 1e-05, %v706_v11  ;;  %v4780_v59 = vsub.f32 %v4453_v54, %v359_v45  ;;  %v5615_v45 = vld [vmem:[#allocation25_spill] sm:$0xff] }
 0x151   :  { %v283_v62 = vpop.xlane.xlu1 %282  ;;  %v286_v43 = vpop.xlane.xlu0 %285  ;;  %3315 = vmatmul.mubr.msk.bf16.gmra.mrb[8].mxu0 %vm109_vm0, %v948_v6  ;;  %3383 = vmatmul.mubr.msk.bf16.gmra.mrb[8].mxu1 %vm109_vm0, %v948_v6  ;;  %v892_v17 = vmul.f32 %v3712_v2, %v4400_v21 }
 0x152   :  { %v3714_v57 = vpop.eup %3713  ;;  %3723 = vrsqrt.f32 %v770_v5  ;;  %v360_v3 = vmul.f32 0.03125, %v283_v62  ;;  %v361_v33 = vmul.f32 0.03125, %v286_v43  ;;  %v487_v19 = vmul.f32 %v4780_v59, %v4780_v59 }
 0x153   :  { %v949_v44 = vpack.c.bf16 %v892_v17, %v891_v22  ;;  %v893_v49 = vmul.f32 %v3714_v57, %v5613_v27  ;;  %v5616_v17 = vld [vmem:[#allocation16_spill] sm:$0xff]  ;;  %v3895_v27 = vmov 1985246804  }
 0x154   :  { %v3716_v54 = vpop.eup %3715  ;;  %v4789_v31 = vsub.f32 %v5611_v55, %v360_v3  ;;  %v4792_v14 = vsub.f32 %v5612_v9, %v361_v33  ;;  %v663_v26 = vsel %vm109_vm0, %v487_v19, 0.0  ;;  %v5617_v3 = vld [vmem:[#allocation17_spill] sm:$0xff] }
 0x155   :  { %v289_v30 = vpop.xlane.xlu1 %288  ;;  %664 = vadd.xlane.f32.xlu1 %v663_v26  ;;  %v557_v21 = vpop.xlane.xlu0 %556  ;;  %3318 = vmatprep.mubr.msk.bf16.mxu0 %vm109_vm0, %v949_v44  ;;  %v894_v39 = vmul.f32 %v3716_v54, %v5614_v51  ;;  %v3894_v26 = vmov 839922192  }
 0x156   :  { %v3718_v63 = vpop.eup %3717  ;;  %v362_v29 = vmul.f32 0.03125, %v289_v30  ;;  %v707_v46 = vmul.f32 0.03125, %v557_v21  ;;  %3386 = vmatprep.mubr.msk.bf16.mxu1 %vm109_vm0, %v949_v44  ;;  %v488_v58 = vmul.f32 %v4789_v31, %v4789_v31  ;;  %v489_v0 = vmul.f32 %v4792_v14, %v4792_v14 }
 0x157   :  { %v950_v13 = vpack.c.bf16 %v894_v39, %v893_v49  ;;  %v895_v57 = vmul.f32 %v3718_v63, %v5616_v17  ;;  %v1685_v30 = vunpack.c.l.s4 %v3894_v26  ;;  %v1687_v21 = vlaneseq }
 0x158   :  { %v3720_v11 = vpop.eup %3719  ;;  %v4804_v6 = vsub.f32 %v5615_v45, %v362_v29  ;;  %v771_v2 = vadd.f32 1e-05, %v707_v46  ;;  %v666_v5 = vsel %vm109_vm0, %v488_v58, 0.0  ;;  %v669_v62 = vsel %vm109_vm0, %v489_v0, 0.0  ;;  %v5618_v0 = vld [vmem:[#allocation18_spill] sm:$0xff] }
 0x159   :  { %v560_v43 = vpop.xlane.xlu1 %559  ;;  %667 = vadd.xlane.f32.xlu0 %v666_v5  ;;  %670 = vadd.xlane.f32.xlu1 %v669_v62  ;;  %v563_v22 = vpop.xlane.xlu0 %562  ;;  %v896_v33 = vmul.f32 %v3720_v11, %v5617_v3  ;;  %v1692_v49 = vunpack.c.l.s4 %v3895_v27  ;;  %v5619_v11 = vld [vmem:[#allocation19_spill] sm:$0xff] }
 0x15a   :  { %v3722_v19 = vpop.eup %3721  ;;  %v708_v44 = vmul.f32 0.03125, %v560_v43  ;;  %v709_v54 = vmul.f32 0.03125, %v563_v22  ;;  %3319 = vmatmul.mubr.msk.bf16.gmra.mrb[12].mxu0 %vm109_vm0, %v950_v13  ;;  %3387 = vmatmul.mubr.msk.bf16.gmra.mrb[12].mxu1 %vm109_vm0, %v950_v13  ;;  %v490_v55 = vmul.f32 %v4804_v6, %v4804_v6  ;;  %3725 = vrsqrt.f32 %v771_v2 }
 0x15b   :  { %v951_v9 = vpack.c.bf16 %v896_v33, %v895_v57  ;;  %v897_v13 = vmul.f32 %v3722_v19, %v5618_v0  ;;  %v1686_v2 = vunpack.c.0.s8 %v1685_v30  ;;  %v1688_v22 = vshrl.u32 %v1687_v21, 7  ;;  %v5620_v57 = vld [vmem:[#allocation27_spill] sm:$0xff] }
 0x15c   :  { %v3724_v51 = vpop.eup %3723  ;;  %v772_v39 = vadd.f32 1e-05, %v708_v44  ;;  %v773_v63 = vadd.f32 1e-05, %v709_v54  ;;  %v672_v29 = vsel %vm109_vm0, %v490_v55, 0.0  ;;  %v1693_v33 = vunpack.c.0.s8 %v1692_v49 }
 0x15d   :  { %v566_v46 = vpop.xlane.xlu1 %565  ;;  %673 = vadd.xlane.f32.xlu0 %v672_v29  ;;  %v292_v58 = vpop.xlane.xlu0 %291  ;;  %3322 = vmatprep.mubr.msk.bf16.mxu0 %vm109_vm0, %v951_v9  ;;  %v898_v45 = vmul.f32 %v3724_v51, %v5619_v11  ;;  %v4826_v26 = vsub.s32 %v1686_v2, %v1688_v22 }
 0x15e   :  { %3727 = vrsqrt.f32 %v772_v39  ;;  %v710_v5 = vmul.f32 0.03125, %v566_v46  ;;  %v363_v62 = vmul.f32 0.03125, %v292_v58  ;;  %3390 = vmatprep.mubr.msk.bf16.mxu1 %vm109_vm0, %v951_v9  ;;  %v4835_v49 = vsub.s32 %v1693_v33, %v1688_v22  ;;  %v5622_v22 = vld [vmem:[#allocation20_spill] sm:$0xff] }
 0x15f   :  { %v952_v43 = vpack.c.bf16 %v898_v45, %v897_v13  ;;  %3729 = vrsqrt.f32 %v773_v63  ;;  %v5621_v13 = vld [vmem:[#allocation32_spill] sm:$0xff] }
 0x160   :  { %v774_v17 = vadd.f32 1e-05, %v710_v5  ;;  %v4820_v3 = vsub.f32 %v5620_v57, %v363_v62  ;;  %v5623_v57 = vld [vmem:[#allocation23_spill] sm:$0xff] }
 0x161   :  { %v295_v44 = vpop.xlane.xlu1 %294  ;;  %v298_v54 = vpop.xlane.xlu0 %297 }
 0x162   :  { %3731 = vrsqrt.f32 %v774_v17  ;;  %v364_v19 = vmul.f32 0.03125, %v295_v44  ;;  %v365_v55 = vmul.f32 0.03125, %v298_v54  ;;  %3323 = vmatmul.mubr.msk.bf16.gmra.mrb[16].mxu0 %vm109_vm0, %v952_v43  ;;  %3391 = vmatmul.mubr.msk.bf16.gmra.mrb[16].mxu1 %vm109_vm0, %v952_v43  ;;  %v491_v9 = vmul.f32 %v4820_v3, %v4820_v3  ;;  %v5624_v54 = vld [vmem:[#allocation28_spill] sm:$0xff] }
 0x164   :  { %v4829_v30 = vsub.f32 %v4520_v12, %v364_v19  ;;  %v4832_v21 = vsub.f32 %v4525_v16, %v365_v55  ;;  %v675_v27 = vsel %vm109_vm0, %v491_v9, 0.0  ;;  %v3726_v63 = vpop.eup %3725  ;;  %v5625_v55 = vld [vmem:[#allocation29_spill] sm:$0xff] }
 0x165   :  { %v301_v51 = vpop.xlane.xlu1 %300  ;;  %676 = vadd.xlane.f32.xlu1 %v675_v27  ;;  %v1681_v39 = vpop.xlane.xlu0 %1680  ;;  %v899_v17 = vmul.f32 %v3726_v63, %v5622_v22 }
 0x166   :  { %v366_v29 = vmul.f32 0.03125, %v301_v51  ;;  %v1682_v46 = vmul.f32 0.03125, %v1681_v39  ;;  %v492_v58 = vmul.f32 %v4829_v30, %v4829_v30  ;;  %v493_v12 = vmul.f32 %v4832_v21, %v4832_v21 }
 0x168   :  { %v3728_v0 = vpop.eup %3727  ;;  %v4842_v16 = vsub.f32 %v5621_v13, %v366_v29  ;;  %v1690_v11 = vrot.slane %v1682_v46, %v4826_v26  ;;  %v1697_v45 = vrot.slane %v1682_v46, %v4835_v49  ;;  %v678_v5 = vsel %vm109_vm0, %v492_v58, 0.0 }
 0x169   :  { %v569_v62 = vpop.xlane.xlu1 %568  ;;  %679 = vadd.xlane.f32.xlu0 %v678_v5  ;;  %v681_v43 = vsel %vm109_vm0, %v493_v12, 0.0  ;;  %v572_v2 = vpop.xlane.xlu0 %571  ;;  %v900_v33 = vmul.f32 %v3728_v0, %v5623_v57  ;;  %v5626_v5 = vld [vmem:[#allocation24_spill] sm:$0xff] }
 0x16a   :  { %v3730_v44 = vpop.eup %3729  ;;  %v4851_v19 = vsub.f32 %v5624_v54, %v1690_v11  ;;  %v4854_v9 = vsub.f32 %v5625_v55, %v1697_v45  ;;  %v711_v27 = vmul.f32 0.03125, %v569_v62  ;;  %682 = vadd.xlane.f32.xlu1 %v681_v43  ;;  %v712_v51 = vmul.f32 0.03125, %v572_v2  ;;  %v5627_v43 = vld [vmem:[#allocation26_spill] sm:$0xff] }
 0x16b   :  { %v494_v39 = vmul.f32 %v4842_v16, %v4842_v16  ;;  %v953_v29 = vpack.c.bf16 %v900_v33, %v899_v17  ;;  %v901_v62 = vmul.f32 %v3730_v44, %v5626_v5 }
 0x16c   :  { %v3732_v46 = vpop.eup %3731  ;;  %v775_v58 = vadd.f32 1e-05, %v711_v27  ;;  %v776_v12 = vadd.f32 1e-05, %v712_v51  ;;  %v1702_v63 = vmul.f32 %v4851_v19, %v4851_v19  ;;  %v1703_v0 = vmul.f32 %v4854_v9, %v4854_v9 }
 0x16d   :  { %v575_v13 = vpop.xlane.xlu1 %574  ;;  %v684_v11 = vsel %vm109_vm0, %v494_v39, 0.0  ;;  %v578_v45 = vpop.xlane.xlu0 %577  ;;  %3326 = vmatprep.mubr.msk.bf16.mxu0 %vm109_vm0, %v953_v29  ;;  %3394 = vmatprep.mubr.msk.bf16.mxu1 %vm109_vm0, %v953_v29  ;;  %v902_v2 = vmul.f32 %v3732_v46, %v5627_v43 }
 0x16e   :  { %3733 = vrsqrt.f32 %v775_v58  ;;  %v713_v22 = vmul.f32 0.03125, %v575_v13  ;;  %685 = vadd.xlane.f32.xlu0 %v684_v11  ;;  %v714_v17 = vmul.f32 0.03125, %v578_v45  ;;  %v1706_v57 = vcombine.low %v1702_v63, %v1703_v0 }
 0x16f   :  { %3735 = vrsqrt.f32 %v776_v12  ;;  %v954_v33 = vpack.c.bf16 %v902_v2, %v901_v62 }
 0x170   :  { %v777_v54 = vadd.f32 1e-05, %v713_v22  ;;  %v778_v55 = vadd.f32 1e-05, %v714_v17  ;;  %v1708_v27 = vsel %vm109_vm0, %v1706_v57, 0.0  ;;  %v5628_v22 = vld [vmem:[#allocation31_spill] sm:$0xff] }
 0x171   :  { %v581_v51 = vpop.xlane.xlu1 %580  ;;  %1709 = vadd.xlane.f32.xlu1 %v1708_v27  ;;  %v584_v39 = vpop.xlane.xlu0 %583  ;;  %3327 = vmatmul.mubr.msk.bf16.gmra.mrb[20].mxu0 %vm109_vm0, %v954_v33 }
 0x172   :  { %3737 = vrsqrt.f32 %v777_v54  ;;  %v715_v44 = vmul.f32 0.03125, %v581_v51  ;;  %v716_v29 = vmul.f32 0.03125, %v584_v39  ;;  %3395 = vmatmul.mubr.msk.bf16.gmra.mrb[20].mxu1 %vm109_vm0, %v954_v33  ;;  %v5629_v54 = vld [vmem:[#allocation30_spill] sm:$0xff] }
 0x173   :  { %3739 = vrsqrt.f32 %v778_v55 }
 0x174   :  { %v779_v46 = vadd.f32 1e-05, %v715_v44  ;;  %v780_v58 = vadd.f32 1e-05, %v716_v29 }
 0x175   :  { %v587_v63 = vpop.xlane.xlu1 %586  ;;  %v590_v12 = vpop.xlane.xlu0 %589 }
 0x176   :  { %3741 = vrsqrt.f32 %v779_v46  ;;  %v717_v0 = vmul.f32 0.03125, %v587_v63  ;;  %v718_v13 = vmul.f32 0.03125, %v590_v12  ;;  %v5630_v63 = vld [vmem:[#allocation34_spill] sm:$0xff] }
 0x177   :  { %3743 = vrsqrt.f32 %v780_v58 }
 0x178   :  { %v3734_v11 = vpop.eup %3733  ;;  %v781_v45 = vadd.f32 1e-05, %v717_v0  ;;  %v782_v5 = vadd.f32 1e-05, %v718_v13 }
 0x179   :  { %v3736_v62 = vpop.eup %3735  ;;  %v593_v43 = vpop.xlane.xlu1 %592  ;;  %v903_v17 = vmul.f32 %v3734_v11, %v5628_v22  ;;  %v5631_v11 = vld [vmem:[#allocation33_spill] sm:$0xff] }
 0x17a   :  { %v596_v2 = vpop.xlane.xlu0 %595  ;;  %3745 = vrsqrt.f32 %v781_v45  ;;  %v719_v57 = vmul.f32 0.03125, %v593_v43  ;;  %v904_v55 = vmul.f32 %v3736_v62, %v5629_v54 }
 0x17b   :  { %v720_v33 = vmul.f32 0.03125, %v596_v2  ;;  %3747 = vrsqrt.f32 %v782_v5 }
 0x17c   :  { %v3738_v27 = vpop.eup %3737  ;;  %v783_v51 = vadd.f32 1e-05, %v719_v57  ;;  %v955_v44 = vpack.c.bf16 %v904_v55, %v903_v17 }
 0x17d   :  { %v784_v39 = vadd.f32 1e-05, %v720_v33  ;;  %v3740_v29 = vpop.eup %3739  ;;  %v599_v46 = vpop.xlane.xlu1 %598  ;;  %v905_v12 = vmul.f32 %v3738_v27, %v5630_v63 }
 0x17e   :  { %v602_v58 = vpop.xlane.xlu0 %601  ;;  %3749 = vrsqrt.f32 %v783_v51  ;;  %v721_v0 = vmul.f32 0.03125, %v599_v46  ;;  %3330 = vmatprep.mubr.msk.bf16.mxu0 %vm109_vm0, %v955_v44  ;;  %3398 = vmatprep.mubr.msk.bf16.mxu1 %vm109_vm0, %v955_v44  ;;  %v906_v45 = vmul.f32 %v3740_v29, %v5631_v11 }
 0x17f   :  { %v722_v13 = vmul.f32 0.03125, %v602_v58  ;;  %3751 = vrsqrt.f32 %v784_v39 }
 0x180   :  { %v3742_v5 = vpop.eup %3741  ;;  %v785_v62 = vadd.f32 1e-05, %v721_v0  ;;  %v956_v2 = vpack.c.bf16 %v906_v45, %v905_v12 }
 0x181   :  { %v786_v43 = vadd.f32 1e-05, %v722_v13  ;;  %v3744_v22 = vpop.eup %3743  ;;  %v605_v17 = vpop.xlane.xlu1 %604  ;;  %v907_v33 = vmul.f32 %v3742_v5, %v4577_v36 }
 0x182   :  { %v608_v57 = vpop.xlane.xlu0 %607  ;;  %3753 = vrsqrt.f32 %v785_v62  ;;  %v723_v54 = vmul.f32 0.03125, %v605_v17  ;;  %3331 = vmatmul.mubr.msk.bf16.gmra.mrb[24].mxu0 %vm109_vm0, %v956_v2  ;;  %3399 = vmatmul.mubr.msk.bf16.gmra.mrb[24].mxu1 %vm109_vm0, %v956_v2  ;;  %v908_v27 = vmul.f32 %v3744_v22, %v4574_v23 }
 0x183   :  { %v724_v55 = vmul.f32 0.03125, %v608_v57  ;;  %3755 = vrsqrt.f32 %v786_v43 }
 0x184   :  { %v3746_v51 = vpop.eup %3745  ;;  %v787_v39 = vadd.f32 1e-05, %v723_v54  ;;  %v957_v29 = vpack.c.bf16 %v908_v27, %v907_v33 }
 0x185   :  { %v788_v44 = vadd.f32 1e-05, %v724_v55  ;;  %v3748_v46 = vpop.eup %3747  ;;  %v611_v58 = vpop.xlane.xlu1 %610  ;;  %v909_v12 = vmul.f32 %v3746_v51, %v4585_v56 }
 0x186   :  { %v614_v63 = vpop.xlane.xlu0 %613  ;;  %3757 = vrsqrt.f32 %v787_v39  ;;  %v725_v36 = vmul.f32 0.03125, %v611_v58  ;;  %3334 = vmatprep.mubr.msk.bf16.mxu0 %vm109_vm0, %v957_v29  ;;  %3402 = vmatprep.mubr.msk.bf16.mxu1 %vm109_vm0, %v957_v29  ;;  %v910_v13 = vmul.f32 %v3748_v46, %v4582_v48 }
 0x187   :  { %v726_v0 = vmul.f32 0.03125, %v614_v63  ;;  %3759 = vrsqrt.f32 %v788_v44 }
 0x188   :  { %v3750_v23 = vpop.eup %3749  ;;  %v789_v11 = vadd.f32 1e-05, %v725_v36  ;;  %v958_v5 = vpack.c.bf16 %v910_v13, %v909_v12 }
 0x189   :  { %v790_v45 = vadd.f32 1e-05, %v726_v0  ;;  %v3752_v62 = vpop.eup %3751  ;;  %v617_v43 = vpop.xlane.xlu1 %616  ;;  %v911_v22 = vmul.f32 %v3750_v23, %v4595_v25 }
 0x18a   :  { %v620_v2 = vpop.xlane.xlu0 %619  ;;  %3761 = vrsqrt.f32 %v789_v11  ;;  %v727_v56 = vmul.f32 0.03125, %v617_v43  ;;  %3335 = vmatmul.mubr.msk.bf16.gmra.mrb[28].mxu0 %vm109_vm0, %v958_v5  ;;  %3403 = vmatmul.mubr.msk.bf16.gmra.mrb[28].mxu1 %vm109_vm0, %v958_v5  ;;  %v912_v57 = vmul.f32 %v3752_v62, %v4592_v20 }
 0x18b   :  { %v728_v17 = vmul.f32 0.03125, %v620_v2  ;;  %3763 = vrsqrt.f32 %v790_v45 }
 0x18c   :  { %v3754_v48 = vpop.eup %3753  ;;  %v791_v33 = vadd.f32 1e-05, %v727_v56  ;;  %v959_v55 = vpack.c.bf16 %v912_v57, %v911_v22 }
 0x18d   :  { %v792_v54 = vadd.f32 1e-05, %v728_v17  ;;  %v3756_v27 = vpop.eup %3755  ;;  %v623_v51 = vpop.xlane.xlu1 %622  ;;  %v913_v44 = vmul.f32 %v3754_v48, %v4609_v41 }
 0x18e   :  { %v626_v39 = vpop.xlane.xlu0 %625  ;;  %3765 = vrsqrt.f32 %v791_v33  ;;  %v729_v25 = vmul.f32 0.03125, %v623_v51  ;;  %3338 = vmatprep.mubr.msk.bf16.mxu0 %vm109_vm0, %v959_v55  ;;  %3406 = vmatprep.mubr.msk.bf16.mxu1 %vm109_vm0, %v959_v55  ;;  %v914_v46 = vmul.f32 %v3756_v27, %v4606_v4 }
 0x18f   :  { %v730_v29 = vmul.f32 0.03125, %v626_v39  ;;  %3767 = vrsqrt.f32 %v792_v54 }
 0x190   :  { %v3758_v20 = vpop.eup %3757  ;;  %v793_v58 = vadd.f32 1e-05, %v729_v25  ;;  %v960_v12 = vpack.c.bf16 %v914_v46, %v913_v44 }
 0x191   :  { %v794_v63 = vadd.f32 1e-05, %v730_v29  ;;  %v3760_v36 = vpop.eup %3759  ;;  %v629_v0 = vpop.xlane.xlu1 %628  ;;  %v915_v23 = vmul.f32 %v3758_v20, %v4625_v15 }
 0x192   :  { %v632_v13 = vpop.xlane.xlu0 %631  ;;  %3769 = vrsqrt.f32 %v793_v58  ;;  %v731_v41 = vmul.f32 0.03125, %v629_v0  ;;  %3339 = vmatmul.mubr.msk.bf16.gmra.mrb[32].mxu0 %vm109_vm0, %v960_v12  ;;  %3407 = vmatmul.mubr.msk.bf16.gmra.mrb[32].mxu1 %vm109_vm0, %v960_v12  ;;  %v916_v45 = vmul.f32 %v3760_v36, %v4622_v60 }
 0x193   :  { %v732_v11 = vmul.f32 0.03125, %v632_v13  ;;  %3771 = vrsqrt.f32 %v794_v63 }
 0x194   :  { %v3762_v4 = vpop.eup %3761  ;;  %v795_v5 = vadd.f32 1e-05, %v731_v41  ;;  %v961_v43 = vpack.c.bf16 %v916_v45, %v915_v23 }
 0x195   :  { %v796_v62 = vadd.f32 1e-05, %v732_v11  ;;  %v3764_v2 = vpop.eup %3763  ;;  %v635_v22 = vpop.xlane.xlu1 %634  ;;  %v917_v17 = vmul.f32 %v3762_v4, %v4633_v38 }
 0x196   :  { %v638_v56 = vpop.xlane.xlu0 %637  ;;  %3773 = vrsqrt.f32 %v795_v5  ;;  %v733_v15 = vmul.f32 0.03125, %v635_v22  ;;  %3342 = vmatprep.mubr.msk.bf16.mxu0 %vm109_vm0, %v961_v43  ;;  %3410 = vmatprep.mubr.msk.bf16.mxu1 %vm109_vm0, %v961_v43  ;;  %v918_v48 = vmul.f32 %v3764_v2, %v4630_v1 }
 0x197   :  { %v734_v57 = vmul.f32 0.03125, %v638_v56  ;;  %3775 = vrsqrt.f32 %v796_v62 }
 0x198   :  { %v3766_v60 = vpop.eup %3765  ;;  %v797_v33 = vadd.f32 1e-05, %v733_v15  ;;  %v962_v55 = vpack.c.bf16 %v918_v48, %v917_v17 }
 0x199   :  { %v798_v54 = vadd.f32 1e-05, %v734_v57  ;;  %v3768_v27 = vpop.eup %3767  ;;  %v641_v51 = vpop.xlane.xlu1 %640  ;;  %v919_v44 = vmul.f32 %v3766_v60, %v4643_v24 }
 0x19a   :  { %v644_v39 = vpop.xlane.xlu0 %643  ;;  %3777 = vrsqrt.f32 %v797_v33  ;;  %v735_v38 = vmul.f32 0.03125, %v641_v51  ;;  %3343 = vmatmul.mubr.msk.bf16.gmra.mrb[36].mxu0 %vm109_vm0, %v962_v55  ;;  %3411 = vmatmul.mubr.msk.bf16.gmra.mrb[36].mxu1 %vm109_vm0, %v962_v55  ;;  %v920_v29 = vmul.f32 %v3768_v27, %v4640_v47 }
 0x19b   :  { %v736_v25 = vmul.f32 0.03125, %v644_v39  ;;  %3779 = vrsqrt.f32 %v798_v54 }
 0x19c   :  { %v3770_v1 = vpop.eup %3769  ;;  %v799_v46 = vadd.f32 1e-05, %v735_v38  ;;  %v963_v58 = vpack.c.bf16 %v920_v29, %v919_v44 }
 0x19d   :  { %v800_v20 = vadd.f32 1e-05, %v736_v25  ;;  %v3772_v63 = vpop.eup %3771  ;;  %v647_v12 = vpop.xlane.xlu1 %646  ;;  %v921_v0 = vmul.f32 %v3770_v1, %v4657_v37 }
 0x19e   :  { %v650_v36 = vpop.xlane.xlu0 %649  ;;  %3781 = vrsqrt.f32 %v799_v46  ;;  %v737_v24 = vmul.f32 0.03125, %v647_v12  ;;  %3346 = vmatprep.mubr.msk.bf16.mxu0 %vm109_vm0, %v963_v58  ;;  %3414 = vmatprep.mubr.msk.bf16.mxu1 %vm109_vm0, %v963_v58  ;;  %v922_v23 = vmul.f32 %v3772_v63, %v4654_v35 }
 0x19f   :  { %v738_v13 = vmul.f32 0.03125, %v650_v36  ;;  %3783 = vrsqrt.f32 %v800_v20 }
 0x1a0   :  { %v3774_v47 = vpop.eup %3773  ;;  %v801_v41 = vadd.f32 1e-05, %v737_v24  ;;  %v964_v45 = vpack.c.bf16 %v922_v23, %v921_v0 }
 0x1a1   :  { %v802_v11 = vadd.f32 1e-05, %v738_v13  ;;  %v3776_v4 = vpop.eup %3775  ;;  %v653_v5 = vpop.xlane.xlu1 %652  ;;  %v923_v43 = vmul.f32 %v3774_v47, %v4673_v18 }
 0x1a2   :  { %v656_v62 = vpop.xlane.xlu0 %655  ;;  %3785 = vrsqrt.f32 %v801_v41  ;;  %v739_v37 = vmul.f32 0.03125, %v653_v5  ;;  %3347 = vmatmul.mubr.msk.bf16.gmra.mrb[40].mxu0 %vm109_vm0, %v964_v45  ;;  %3415 = vmatmul.mubr.msk.bf16.gmra.mrb[40].mxu1 %vm109_vm0, %v964_v45  ;;  %v924_v22 = vmul.f32 %v3776_v4, %v4670_v53 }
 0x1a3   :  { %v740_v2 = vmul.f32 0.03125, %v656_v62  ;;  %3787 = vrsqrt.f32 %v802_v11 }
 0x1a4   :  { %v3778_v35 = vpop.eup %3777  ;;  %v803_v56 = vadd.f32 1e-05, %v739_v37  ;;  %v965_v15 = vpack.c.bf16 %v924_v22, %v923_v43 }
 0x1a5   :  { %v804_v17 = vadd.f32 1e-05, %v740_v2  ;;  %v3780_v57 = vpop.eup %3779  ;;  %v659_v48 = vpop.xlane.xlu1 %658  ;;  %v925_v33 = vmul.f32 %v3778_v35, %v4681_v50 }
 0x1a6   :  { %v662_v60 = vpop.xlane.xlu0 %661  ;;  %3789 = vrsqrt.f32 %v803_v56  ;;  %v741_v18 = vmul.f32 0.03125, %v659_v48  ;;  %3350 = vmatprep.mubr.msk.bf16.mxu0 %vm109_vm0, %v965_v15  ;;  %3418 = vmatprep.mubr.msk.bf16.mxu1 %vm109_vm0, %v965_v15  ;;  %v926_v55 = vmul.f32 %v3780_v57, %v4678_v32 }
 0x1a7   :  { %v742_v54 = vmul.f32 0.03125, %v662_v60  ;;  %3791 = vrsqrt.f32 %v804_v17 }
 0x1a8   :  { %v3782_v53 = vpop.eup %3781  ;;  %v805_v27 = vadd.f32 1e-05, %v741_v18  ;;  %v966_v39 = vpack.c.bf16 %v926_v55, %v925_v33 }
 0x1a9   :  { %v806_v51 = vadd.f32 1e-05, %v742_v54  ;;  %v3784_v44 = vpop.eup %3783  ;;  %v927_v38 = vmul.f32 %v3782_v53, %v4691_v34 }
 0x1aa   :  { %3793 = vrsqrt.f32 %v805_v27  ;;  %3351 = vmatmul.mubr.msk.bf16.gmra.mrb[44].mxu0 %vm109_vm0, %v966_v39  ;;  %3419 = vmatmul.mubr.msk.bf16.gmra.mrb[44].mxu1 %vm109_vm0, %v966_v39  ;;  %v928_v50 = vmul.f32 %v3784_v44, %v4688_v8 }
 0x1ab   :  { %3795 = vrsqrt.f32 %v806_v51 }
 0x1ac   :  { %v3786_v25 = vpop.eup %3785  ;;  %v967_v29 = vpack.c.bf16 %v928_v50, %v927_v38 }
 0x1ad   :  { %v3788_v1 = vpop.eup %3787  ;;  %v929_v32 = vmul.f32 %v3786_v25, %v4705_v42 }
 0x1ae   :  { %3354 = vmatprep.mubr.msk.bf16.mxu0 %vm109_vm0, %v967_v29  ;;  %3422 = vmatprep.mubr.msk.bf16.mxu1 %vm109_vm0, %v967_v29  ;;  %v930_v46 = vmul.f32 %v3788_v1, %v4702_v52 }
 0x1b0   :  { %v3790_v34 = vpop.eup %3789  ;;  %v968_v20 = vpack.c.bf16 %v930_v46, %v929_v32 }
 0x1b1   :  { %v3792_v58 = vpop.eup %3791  ;;  %v931_v63 = vmul.f32 %v3790_v34, %v4721_v10 }
 0x1b2   :  { %3355 = vmatmul.mubr.msk.bf16.gmra.mrb[48].mxu0 %vm109_vm0, %v968_v20  ;;  %3423 = vmatmul.mubr.msk.bf16.gmra.mrb[48].mxu1 %vm109_vm0, %v968_v20  ;;  %v932_v8 = vmul.f32 %v3792_v58, %v4718_v40 }
 0x1b4   :  { %v3794_v12 = vpop.eup %3793  ;;  %v969_v36 = vpack.c.bf16 %v932_v8, %v931_v63 }
 0x1b5   :  { %v3796_v42 = vpop.eup %3795  ;;  %v933_v0 = vmul.f32 %v3794_v12, %v4729_v7 }
 0x1b6   :  { %3358 = vmatprep.mubr.msk.bf16.mxu0 %vm109_vm0, %v969_v36  ;;  %3426 = vmatprep.mubr.msk.bf16.mxu1 %vm109_vm0, %v969_v36  ;;  %v934_v52 = vmul.f32 %v3796_v42, %v4726_v61 }
 0x1b8   :  { %v970_v24 = vpack.c.bf16 %v934_v52, %v933_v0 }
 0x1ba   :  { %3359 = vmatmul.mubr.msk.bf16.gmra.mrb[52].mxu0 %vm109_vm0, %v970_v24  ;;  %3427 = vmatmul.mubr.msk.bf16.gmra.mrb[52].mxu1 %vm109_vm0, %v970_v24 }
 0x1e2   :  { %v665_v10 = vpop.xlane.xlu1 %664 }
 0x1e3   :  { %v743_v13 = vmul.f32 0.03125, %v665_v10 }
 0x1e5   :  { %v807_v23 = vadd.f32 1e-05, %v743_v13 }
 0x1e6   :  { %v671_v40 = vpop.xlane.xlu1 %670  ;;  %v668_v47 = vpop.xlane.xlu0 %667 }
 0x1e7   :  { %v745_v41 = vmul.f32 0.03125, %v671_v40  ;;  %v744_v11 = vmul.f32 0.03125, %v668_v47  ;;  %3797 = vrsqrt.f32 %v807_v23 }
 0x1e9   :  { %v809_v45 = vadd.f32 1e-05, %v745_v41  ;;  %v808_v7 = vadd.f32 1e-05, %v744_v11 }
 0x1ea   :  { %v674_v4 = vpop.xlane.xlu0 %673 }
 0x1eb   :  { %v746_v5 = vmul.f32 0.03125, %v674_v4  ;;  %3799 = vrsqrt.f32 %v808_v7 }
 0x1ec   :  { %3801 = vrsqrt.f32 %v809_v45 }
 0x1ed   :  { %v810_v61 = vadd.f32 1e-05, %v746_v5 }
 0x1ef   :  { %3803 = vrsqrt.f32 %v810_v61 }
 0x1f1   :  { %v3798_v37 = vpop.eup %3797 }
 0x1f2   :  { %v677_v62 = vpop.xlane.xlu1 %676  ;;  %v935_v57 = vmul.f32 %v3798_v37, %v4780_v59 }
 0x1f3   :  { %v747_v43 = vmul.f32 0.03125, %v677_v62 }
 0x1f5   :  { %v811_v2 = vadd.f32 1e-05, %v747_v43  ;;  %v3800_v22 = vpop.eup %3799 }
 0x1f6   :  { %v680_v35 = vpop.xlane.xlu0 %679  ;;  %v3802_v56 = vpop.eup %3801  ;;  %v936_v48 = vmul.f32 %v3800_v22, %v4789_v31 }
 0x1f7   :  { %v683_v17 = vpop.xlane.xlu1 %682  ;;  %v748_v15 = vmul.f32 0.03125, %v680_v35  ;;  %3805 = vrsqrt.f32 %v811_v2  ;;  %v937_v53 = vmul.f32 %v3802_v56, %v4792_v14 }
 0x1f8   :  { %v749_v60 = vmul.f32 0.03125, %v683_v17  ;;  %v971_v54 = vpack.c.bf16 %v936_v48, %v935_v57 }
 0x1f9   :  { %v3804_v33 = vpop.eup %3803  ;;  %v812_v18 = vadd.f32 1e-05, %v748_v15 }
 0x1fa   :  { %v813_v55 = vadd.f32 1e-05, %v749_v60  ;;  %v938_v27 = vmul.f32 %v3804_v33, %v4804_v6  ;;  %3362 = vmatprep.mubr.msk.bf16.mxu0 %vm109_vm0, %v971_v54  ;;  %3430 = vmatprep.mubr.msk.bf16.mxu1 %vm109_vm0, %v971_v54 }
 0x1fb   :  { %3807 = vrsqrt.f32 %v812_v18  ;;  %v686_v51 = vpop.xlane.xlu0 %685 }
 0x1fc   :  { %v750_v39 = vmul.f32 0.03125, %v686_v51  ;;  %v972_v59 = vpack.c.bf16 %v938_v27, %v937_v53  ;;  %3809 = vrsqrt.f32 %v813_v55 }
 0x1fe   :  { %v814_v31 = vadd.f32 1e-05, %v750_v39  ;;  %v1710_v44 = vpop.xlane.xlu1 %1709  ;;  %3363 = vmatmul.mubr.msk.bf16.gmra.mrb[56].mxu0 %vm109_vm0, %v972_v59  ;;  %3431 = vmatmul.mubr.msk.bf16.gmra.mrb[56].mxu1 %vm109_vm0, %v972_v59 }
 0x1ff   :  { %v1711_v38 = vmul.f32 0.03125, %v1710_v44 }
 0x200   :  { %3811 = vrsqrt.f32 %v814_v31 }
 0x201   :  { %v1712_v14 = vadd.f32 1e-05, %v1711_v38  ;;  %v3806_v50 = vpop.eup %3805 }
 0x202   :  { %v939_v25 = vmul.f32 %v3806_v50, %v4820_v3  ;;  %v5561_v3 = vmov 0.0  }
 0x203   :  { %3813 = vrsqrt.f32 %v1712_v14 }
 0x205   :  { %v3808_v6 = vpop.eup %3807 }
 0x206   :  { %v940_v29 = vmul.f32 %v3808_v6, %v4829_v30  ;;  %v3810_v1 = vpop.eup %3809 }
 0x207   :  { %v941_v34 = vmul.f32 %v3810_v1, %v4832_v21 }
 0x208   :  { %v973_v32 = vpack.c.bf16 %v940_v29, %v939_v25 }
 0x20a   :  { %v3812_v46 = vpop.eup %3811  ;;  %3366 = vmatprep.mubr.msk.bf16.mxu0 %vm109_vm0, %v973_v32  ;;  %3434 = vmatprep.mubr.msk.bf16.mxu1 %vm109_vm0, %v973_v32 }
 0x20b   :  { %v942_v20 = vmul.f32 %v3812_v46, %v4842_v16 }
 0x20d   :  { %v3814_v58 = vpop.eup %3813  ;;  %v974_v63 = vpack.c.bf16 %v942_v20, %v941_v34 }
 0x20e   :  { %v1721_v8 = vrot.slane %v3814_v58, %v4826_v26  ;;  %v1728_v12 = vrot.slane %v3814_v58, %v4835_v49 }
 0x20f   :  { %3367 = vmatmul.mubr.msk.bf16.gmra.mrb[60].mxu0 %vm109_vm0, %v974_v63  ;;  %3435 = vmatmul.mubr.msk.bf16.gmra.mrb[60].mxu1 %vm109_vm0, %v974_v63 }
 0x210   :  { %3446 = vmatprep.mubr.msk.f32.mxu0 %vm3896_vm1, %v5561_v3  ;;  %v1731_v30 = vmul.f32 %v1721_v8, %v4851_v19  ;;  %v1732_v21 = vmul.f32 %v1728_v12, %v4854_v9 }
 0x212   :  { %v1735_v26 = vcombine.low %v1731_v30, %v1732_v21 }
 0x214   :  { %v4956_v16 = vpop.f32.mrb[0].mxu0  ;;  %v4958_v36 = vpop.f32.mrb[0].mxu1 }
 0x215   :  { %v1117_v42 = vpop.f32.mrb[1].mxu0  ;;  %v4960_v49 = vpop.f32.mrb[1].mxu1 }
 0x216   :  { %v3309_v0 = vpop.f32.mrb[2].mxu0  ;;  %v4962_v52 = vpop.f32.mrb[2].mxu1 }
 0x217   :  { %v3506_v24 = vpack.c.bf16 %v3309_v0, %v4956_v16  ;;  %3447 = vmatmul.mubr.msk.f32.vlgmr.msra.gmra.mrb[64].mxu0 %vm109_vm0, %v1735_v26  ;;  %v1120_v19 = vpop.f32.mrb[3].mxu0  ;;  %v4968_v9 = vpop.f32.mrb[3].mxu1 }
 0x218   :  { %v3500_v13 = vpack.c.bf16 %v1120_v19, %v1117_v42 }
 0x21c   :  { %v4972_v40 = vpop.f32.mrb[4].mxu0  ;;  %v4974_v47 = vpop.f32.mrb[4].mxu1 }
 0x21d   :  { %v4976_v41 = vpop.f32.mrb[5].mxu0  ;;  %v4978_v11 = vpop.f32.mrb[5].mxu1 }
 0x21e   :  { %v4980_v45 = vpop.f32.mrb[6].mxu0  ;;  %v4982_v7 = vpop.f32.mrb[6].mxu1 }
 0x21f   :  { %v3518_v4 = vpack.c.bf16 %v4980_v45, %v4972_v40  ;;  %v1136_v61 = vpop.f32.mrb[7].mxu0  ;;  %v4988_v62 = vpop.f32.mrb[7].mxu1 }
 0x220   :  { %v3512_v43 = vpack.c.bf16 %v1136_v61, %v4976_v41 }
 0x224   :  { %v4993_v2 = vpop.f32.mrb[8].mxu0  ;;  %v4995_v22 = vpop.f32.mrb[8].mxu1 }
 0x225   :  { %v4997_v35 = vpop.f32.mrb[9].mxu0  ;;  %v4999_v56 = vpop.f32.mrb[9].mxu1 }
 0x226   :  { %v5001_v17 = vpop.f32.mrb[10].mxu0  ;;  %v5003_v15 = vpop.f32.mrb[10].mxu1 }
 0x227   :  { %v3530_v57 = vpack.c.bf16 %v5001_v17, %v4993_v2  ;;  %v5009_v60 = vpop.f32.mrb[11].mxu0  ;;  %v5011_v33 = vpop.f32.mrb[11].mxu1 }
 0x228   :  { %v3524_v18 = vpack.c.bf16 %v5009_v60, %v4997_v35 }
 0x22d   :  { %v5017_v55 = vpop.f32.mrb[12].mxu0  ;;  %v5019_v53 = vpop.f32.mrb[12].mxu1 }
 0x22e   :  { %v5021_v27 = vpop.f32.mrb[13].mxu0  ;;  %v5023_v51 = vpop.f32.mrb[13].mxu1 }
 0x22f   :  { %v5025_v39 = vpop.f32.mrb[14].mxu0  ;;  %v5027_v59 = vpop.f32.mrb[14].mxu1 }
 0x230   :  { %v3542_v31 = vpack.c.bf16 %v5025_v39, %v5017_v55  ;;  %v5033_v38 = vpop.f32.mrb[15].mxu0  ;;  %v5035_v14 = vpop.f32.mrb[15].mxu1 }
 0x231   :  { %v3536_v50 = vpack.c.bf16 %v5033_v38, %v5021_v27 }
 0x235   :  { %v3324_v25 = vpop.f32.mrb[16].mxu0  ;;  %v5041_v29 = vpop.f32.mrb[16].mxu1 }
 0x236   :  { %v1181_v1 = vpop.f32.mrb[17].mxu0  ;;  %v5043_v32 = vpop.f32.mrb[17].mxu1 }
 0x237   :  { %v3325_v46 = vpop.f32.mrb[18].mxu0  ;;  %v5045_v34 = vpop.f32.mrb[18].mxu1 }
 0x238   :  { %v3503_v20 = vpack.c.bf16 %v3325_v46, %v3324_v25  ;;  %v1184_v63 = vpop.f32.mrb[19].mxu0  ;;  %v5049_v8 = vpop.f32.mrb[19].mxu1 }
 0x239   :  { %v3497_v30 = vpack.c.bf16 %v1184_v63, %v1181_v1  ;;  %v3593_v21 = vpack.c.bf16 %v5049_v8, %v5043_v32 }
 0x23b   :  { %3499 = vmatprep.subr.msk.bf16.mxu1 %vm5053_vm2, %v3497_v30 }
 0x23c   :  { %3502 = vmatpush3.bf16.xpose.msk.msra.mxu1 %vm5053_vm2, %v3500_v13 }
 0x23d   :  { %3505 = vmatprep.subr.msk.bf16.mxu1 %vm5053_vm2, %v3503_v20 }
 0x244   :  { %3508 = vmatpush3.bf16.xpose.msk.msra.mxu1 %vm5053_vm2, %v3506_v24  ;;  %v3328_v16 = vpop.f32.mrb[20].mxu0 }
 0x245   :  { %v5067_v26 = vpop.f32.mrb[20].mxu1  ;;  %v1197_v42 = vpop.f32.mrb[21].mxu0 }
 0x246   :  { %v5069_v0 = vpop.f32.mrb[21].mxu1  ;;  %v3329_v19 = vpop.f32.mrb[22].mxu0 }
 0x247   :  { %v3515_v40 = vpack.c.bf16 %v3329_v19, %v3328_v16  ;;  %v5071_v41 = vpop.f32.mrb[22].mxu1  ;;  %v1200_v45 = vpop.f32.mrb[23].mxu0 }
 0x248   :  { %v3509_v61 = vpack.c.bf16 %v1200_v45, %v1197_v42  ;;  %v5075_v35 = vpop.f32.mrb[23].mxu1 }
 0x24a   :  { %3511 = vmatprep.subr.msk.bf16.mxu1 %vm5053_vm2, %v3509_v61 }
 0x24c   :  { %3514 = vmatpush3.bf16.xpose.msk.msra.mxu1 %vm5053_vm2, %v3512_v43 }
 0x24d   :  { %3517 = vmatprep.subr.msk.bf16.mxu1 %vm5053_vm2, %v3515_v40 }
 0x254   :  { %3520 = vmatpush3.bf16.xpose.msk.msra.mxu1 %vm5053_vm2, %v3518_v4 }
 0x255   :  { %v3332_v60 = vpop.f32.mrb[24].mxu0  ;;  %v5087_v25 = vpop.f32.mrb[24].mxu1 }
 0x256   :  { %v1213_v1 = vpop.f32.mrb[25].mxu0  ;;  %v5089_v46 = vpop.f32.mrb[25].mxu1 }
 0x257   :  { %v3333_v20 = vpop.f32.mrb[26].mxu0  ;;  %v5091_v63 = vpop.f32.mrb[26].mxu1 }
 0x258   :  { %v3527_v30 = vpack.c.bf16 %v3333_v20, %v3332_v60  ;;  %v1216_v43 = vpop.f32.mrb[27].mxu0  ;;  %v5095_v42 = vpop.f32.mrb[27].mxu1 }
 0x259   :  { %v3521_v19 = vpack.c.bf16 %v1216_v43, %v1213_v1 }
 0x25b   :  { %3523 = vmatprep.subr.msk.bf16.mxu1 %vm5053_vm2, %v3521_v19 }
 0x25c   :  { %3526 = vmatpush3.bf16.xpose.msk.msra.mxu1 %vm5053_vm2, %v3524_v18 }
 0x25d   :  { %v3336_v40 = vpop.f32.mrb[28].mxu0  ;;  %v5103_v45 = vpop.f32.mrb[28].mxu1  ;;  %3529 = vmatprep.subr.msk.bf16.mxu1 %vm5053_vm2, %v3527_v30 }
 0x25e   :  { %v1229_v61 = vpop.f32.mrb[29].mxu0  ;;  %v5107_v60 = vpop.f32.mrb[29].mxu1 }
 0x25f   :  { %v3337_v20 = vpop.f32.mrb[30].mxu0  ;;  %v5109_v1 = vpop.f32.mrb[30].mxu1 }
 0x260   :  { %v3539_v43 = vpack.c.bf16 %v3337_v20, %v3336_v40  ;;  %v1232_v19 = vpop.f32.mrb[31].mxu0  ;;  %v5113_v6 = vpop.f32.mrb[31].mxu1 }
 0x261   :  { %v3533_v18 = vpack.c.bf16 %v1232_v19, %v1229_v61 }
 0x264   :  { %3532 = vmatpush3.bf16.xpose.msk.msra.mxu1 %vm5053_vm2, %v3530_v57 }
 0x265   :  { %v5122_v30 = vpop.f32.mrb[32].mxu0  ;;  %v5124_v16 = vpop.f32.mrb[32].mxu1  ;;  %3535 = vmatprep.subr.msk.bf16.mxu1 %vm5053_vm2, %v3533_v18 }
 0x266   :  { %v5128_v40 = vpop.f32.mrb[33].mxu0  ;;  %v5130_v20 = vpop.f32.mrb[33].mxu1 }
 0x267   :  { %v5132_v61 = vpop.f32.mrb[34].mxu0  ;;  %v5134_v19 = vpop.f32.mrb[34].mxu1 }
 0x268   :  { %v1248_v57 = vpop.f32.mrb[35].mxu0  ;;  %v5140_v44 = vpop.f32.mrb[35].mxu1 }
 0x269   :  { %v3548_v48 = vpack.c.bf16 %v1248_v57, %v5128_v40 }
 0x26c   :  { %3538 = vmatpush3.bf16.xpose.msk.msra.mxu1 %vm5053_vm2, %v3536_v50 }
 0x26d   :  { %v5150_v54 = vpop.f32.mrb[36].mxu0  ;;  %v5152_v4 = vpop.f32.mrb[36].mxu1  ;;  %3541 = vmatprep.subr.msk.bf16.mxu1 %vm5053_vm2, %v3539_v43 }
 0x26e   :  { %5634 = vst [vmem:[#allocation8_spill] sm:$0xff] %v5152_v4  ;;  %v5156_v17 = vpop.f32.mrb[37].mxu0  ;;  %v5158_v5 = vpop.f32.mrb[37].mxu1 }
 0x26f   :  { %5635 = vst [vmem:[#allocation9_spill] sm:$0xff] %v5158_v5  ;;  %v5160_v40 = vpop.f32.mrb[38].mxu0  ;;  %v5162_v57 = vpop.f32.mrb[38].mxu1 }
 0x270   :  { %5636 = vst [vmem:[#allocation10_spill] sm:$0xff] %v5162_v57  ;;  %v1264_v50 = vpop.f32.mrb[39].mxu0  ;;  %v5168_v18 = vpop.f32.mrb[39].mxu1 }
 0x271   :  { %5637 = vst [vmem:[#allocation11_spill] sm:$0xff] %v5168_v18  ;;  %v3560_v3 = vpack.c.bf16 %v1264_v50, %v5156_v17 }
 0x274   :  { %3544 = vmatpush3.bf16.xpose.msk.msra.mxu1 %vm5053_vm2, %v3542_v31 }
 0x275   :  { %v5178_v13 = vpop.f32.mrb[40].mxu0  ;;  %v5180_v37 = vpop.f32.mrb[40].mxu1  ;;  %3594 = vmatprep.subr.bf16.mxu1 %v3593_v21 }
 0x276   :  { %5638 = vst [vmem:[#allocation12_spill] sm:$0xff] %v5180_v37  ;;  %v5185_v38 = vpop.f32.mrb[41].mxu0  ;;  %v5187_v17 = vpop.f32.mrb[41].mxu1 }
 0x277   :  { %5639 = vst [vmem:[#allocation13_spill] sm:$0xff] %v5187_v17  ;;  %v5189_v50 = vpop.f32.mrb[42].mxu0  ;;  %v5191_v43 = vpop.f32.mrb[42].mxu1 }
 0x278   :  { %5640 = vst [vmem:[#allocation21_spill] sm:$0xff] %v5191_v43  ;;  %v1280_v31 = vpop.f32.mrb[43].mxu0  ;;  %v5197_v24 = vpop.f32.mrb[43].mxu1 }
 0x279   :  { %5641 = vst [vmem:[#allocation22_spill] sm:$0xff] %v5197_v24  ;;  %v3572_v32 = vpack.c.bf16 %v1280_v31, %v5185_v38 }
 0x27d   :  { %v5202_v21 = vpop.f32.mrb[44].mxu0  ;;  %v5204_v10 = vpop.f32.mrb[44].mxu1 }
 0x27e   :  { %5642 = vst [vmem:[#allocation14_spill] sm:$0xff] %v5204_v10  ;;  %v5206_v28 = vpop.f32.mrb[45].mxu0  ;;  %v5208_v58 = vpop.f32.mrb[45].mxu1 }
 0x27f   :  { %5643 = vst [vmem:[#allocation15_spill] sm:$0xff] %v5208_v58  ;;  %v5210_v23 = vpop.f32.mrb[46].mxu0  ;;  %v5212_v55 = vpop.f32.mrb[46].mxu1 }
 0x280   :  { %5644 = vst [vmem:[#allocation25_spill] sm:$0xff] %v5212_v55  ;;  %v5218_v31 = vpop.f32.mrb[47].mxu0  ;;  %v5220_v8 = vpop.f32.mrb[47].mxu1 }
 0x281   :  { %5645 = vst [vmem:[#allocation16_spill] sm:$0xff] %v5220_v8 }
 0x285   :  { %v3356_v37 = vpop.f32.mrb[48].mxu0  ;;  %v5226_v43 = vpop.f32.mrb[48].mxu1 }
 0x286   :  { %v1309_v17 = vpop.f32.mrb[49].mxu0  ;;  %v5228_v24 = vpop.f32.mrb[49].mxu1 }
 0x287   :  { %v3357_v39 = vpop.f32.mrb[50].mxu0  ;;  %v5230_v4 = vpop.f32.mrb[50].mxu1 }
 0x288   :  { %v3551_v38 = vpack.c.bf16 %v3357_v39, %v3356_v37  ;;  %v1312_v55 = vpop.f32.mrb[51].mxu0  ;;  %v5234_v57 = vpop.f32.mrb[51].mxu1 }
 0x289   :  { %v3545_v27 = vpack.c.bf16 %v1312_v55, %v1309_v17 }
 0x28b   :  { %3547 = vmatprep.subr.msk.bf16.mxu0 %vm5053_vm2, %v3545_v27 }
 0x28c   :  { %3550 = vmatpush3.bf16.xpose.msk.msra.mxu0 %vm5053_vm2, %v3548_v48 }
 0x28d   :  { %v3360_v58 = vpop.f32.mrb[52].mxu0  ;;  %v5242_v8 = vpop.f32.mrb[52].mxu1  ;;  %3553 = vmatprep.subr.msk.bf16.mxu0 %vm5053_vm2, %v3551_v38  ;;  %v5646_v38 = vpack.c.bf16 %v5132_v61, %v5122_v30 }
 0x28e   :  { %v1325_v37 = vpop.f32.mrb[53].mxu0  ;;  %v5246_v39 = vpop.f32.mrb[53].mxu1 }
 0x28f   :  { %v3361_v10 = vpop.f32.mrb[54].mxu0  ;;  %v5248_v17 = vpop.f32.mrb[54].mxu1 }
 0x290   :  { %v3563_v55 = vpack.c.bf16 %v3361_v10, %v3360_v58  ;;  %v1328_v27 = vpop.f32.mrb[55].mxu0  ;;  %v5252_v5 = vpop.f32.mrb[55].mxu1  ;;  %v5647_v10 = vpack.c.bf16 %v5160_v40, %v5150_v54 }
 0x291   :  { %v3557_v48 = vpack.c.bf16 %v1328_v27, %v1325_v37 }
 0x294   :  { %3556 = vmatpush3.bf16.xpose.msk.msra.mxu0 %vm5053_vm2, %v5646_v38 }
 0x295   :  { %3559 = vmatprep.subr.msk.bf16.mxu0 %vm5053_vm2, %v3557_v48 }
 0x29c   :  { %3562 = vmatpush3.bf16.xpose.msk.msra.mxu0 %vm5053_vm2, %v3560_v3 }
 0x29d   :  { %3565 = vmatprep.subr.msk.bf16.mxu0 %vm5053_vm2, %v3563_v55 }
 0x2a4   :  { %3568 = vmatpush3.bf16.xpose.msk.msra.mxu0 %vm5053_vm2, %v5647_v10  ;;  %v5648_v10 = vpack.c.bf16 %v5189_v50, %v5178_v13 }
 0x2d1   :  { %v3364_v58 = vpop.f32.mrb[56].mxu0  ;;  %v5272_v30 = vpop.f32.mrb[56].mxu1 }
 0x2d2   :  { %v1341_v61 = vpop.f32.mrb[57].mxu0  ;;  %v5274_v37 = vpop.f32.mrb[57].mxu1 }
 0x2d3   :  { %v3365_v27 = vpop.f32.mrb[58].mxu0  ;;  %v5276_v48 = vpop.f32.mrb[58].mxu1 }
 0x2d4   :  { %v3575_v38 = vpack.c.bf16 %v3365_v27, %v3364_v58  ;;  %v1344_v55 = vpop.f32.mrb[59].mxu0  ;;  %v5280_v2 = vpop.f32.mrb[59].mxu1 }
 0x2d5   :  { %v3569_v54 = vpack.c.bf16 %v1344_v55, %v1341_v61 }
 0x2d7   :  { %3571 = vmatprep.subr.msk.bf16.mxu0 %vm5053_vm2, %v3569_v54 }
 0x2d8   :  { %3574 = vmatpush3.bf16.xpose.msk.msra.mxu0 %vm5053_vm2, %v3572_v32 }
 0x2d9   :  { %3577 = vmatprep.subr.msk.bf16.mxu0 %vm5053_vm2, %v3575_v38 }
 0x2e0   :  { %3580 = vmatpush3.bf16.xpose.msk.msra.mxu0 %vm5053_vm2, %v5648_v10  ;;  %v5650_v10 = vpack.c.bf16 %v5218_v31, %v5206_v28  ;;  %v5652_v28 = vpack.c.bf16 %v5045_v34, %v5041_v29  ;;  %v5653_v31 = vpack.c.bf16 %v5210_v23, %v5202_v21  ;;  %v5658_v23 = vpack.c.bf16 %v5071_v41, %v5067_v26 }
 0x2e1   :  { %v5659_v29 = vmov 0.0   ;;  %v5664_v34 = vpack.c.bf16 %v5003_v15, %v4995_v22  ;;  %v5669_v22 = vpack.c.bf16 %v5234_v57, %v5228_v24 }
 0x2e2   :  { %v3368_v58 = vpop.f32.mrb[60].mxu0  ;;  %v5295_v61 = vpop.f32.mrb[60].mxu1 }
 0x2e3   :  { %5649 = vst [vmem:[#allocation17_spill] sm:$0xff] %v5295_v61  ;;  %v1357_v27 = vpop.f32.mrb[61].mxu0  ;;  %v5297_v55 = vpop.f32.mrb[61].mxu1 }
 0x2e4   :  { %v3369_v3 = vpop.f32.mrb[62].mxu0  ;;  %v5299_v54 = vpop.f32.mrb[62].mxu1 }
 0x2e5   :  { %v3587_v40 = vpack.c.bf16 %v3369_v3, %v3368_v58  ;;  %v1360_v38 = vpop.f32.mrb[63].mxu0  ;;  %v5303_v18 = vpop.f32.mrb[63].mxu1 }
 0x2e6   :  { %v3581_v13 = vpack.c.bf16 %v1360_v38, %v1357_v27  ;;  %v3649_v50 = vpack.c.bf16 %v5303_v18, %v5297_v55  ;;  %v5651_v27 = vpack.c.bf16 %v4968_v9, %v4960_v49  ;;  %v5656_v49 = vpack.c.bf16 %v5075_v35, %v5069_v0  ;;  %v2920_v18 = vld [vmem:[%s5531_s3 + $0x20] sm:$0xff]  ;;  %v2921_v55 = vld [vmem:[%s5531_s3 + $0x28] sm:$0xff] }
 0x2e7   :  { %v5657_v9 = vpack.c.bf16 %v4988_v62, %v4978_v11  ;;  %v5662_v11 = vpack.c.bf16 %v5011_v33, %v4999_v56  ;;  %v5663_v62 = vpack.c.bf16 %v5091_v63, %v5087_v25  ;;  %v5667_v56 = vpack.c.bf16 %v5109_v1, %v5103_v45 }
 0x2e8   :  { %3583 = vmatprep.subr.msk.bf16.mxu0 %vm5053_vm2, %v3581_v13  ;;  %v5668_v33 = vpack.c.bf16 %v5027_v59, %v5019_v53 }
 0x2e9   :  { %3586 = vmatpush3.bf16.xpose.msk.msra.mxu0 %vm5053_vm2, %v5650_v10 }
 0x2ea   :  { %v1804_v3 = vpop.f32.mrb[64].mxu0  ;;  %3589 = vmatprep.subr.msk.bf16.mxu0 %vm5053_vm2, %v3587_v40  ;;  %v5654_v40 = vmov 0.0|0.0  }
 0x2eb   :  { %v1808_v58 = vmul.f32 0.17677669, %v1804_v3  ;;  %v3448_v32 = vpop.f32.mrb[65].mxu0 }
 0x2ec   :  { %v5655_v32 = vpack.c.bf16 %v4962_v52, %v4958_v36  ;;  %v5660_v36 = vpack.c.bf16 %v4982_v7, %v4974_v47  ;;  %v5661_v52 = vpack.c.bf16 %v5095_v42, %v5089_v46  ;;  %v5665_v47 = vpack.c.bf16 %v5113_v6, %v5107_v60 }
 0x2ed   :  { %v1810_v61 = vcombine.high %v1808_v58, %v1808_v58  ;;  %3178 = vmatprep.mubr.msk.f32.mxu1 %vm109_vm0, %v1808_v58  ;;  %v5666_v7 = vpack.c.bf16 %v5035_v14, %v5023_v51 }
 0x2ee   :  { %3179 = vmatmul.mubr.msk.f32.vlgmr.msra.gmra.mrb[64].mxu1 %vm109_vm0, %v1808_v58 }
 0x2ef   :  { %3596 = vmatpush3.bf16.msra.mxu1 %v5651_v27  ;;  %3212 = vmatprep.mubr.msk.f32.mxu0 %vm109_vm0, %v1810_v61 }
 0x2f0   :  { %3598 = vmatprep.subr.bf16.mxu1 %v5652_v28 }
 0x2f1   :  { %3592 = vmatpush3.bf16.xpose.msk.msra.mxu0 %vm5053_vm2, %v5653_v31 }
 0x2f2   :  { %3657 = vmatprep.subr.bf16.mxu0 %v5654_v40 }
 0x2f3   :  { %3600 = vmatpush3.bf16.msra.mxu1 %v5655_v32 }
 0x2f4   :  { %3602 = vmatprep.subr.bf16.mxu1 %v5656_v49 }
 0x2f7   :  { %3604 = vmatpush3.bf16.msra.mxu1 %v5657_v9 }
 0x2f8   :  { %3606 = vmatprep.subr.bf16.mxu1 %v5658_v23  ;;  %3213 = vmatmul.mubr.msk.f32.vlgmr.msra.gmra.mrb[66].mxu0 %vm109_vm0, %v1810_v61 }
 0x2f9   :  { %3457 = vmatprep.mubr.msk.f32.mxu0 %vm3896_vm1, %v5659_v29 }
 0x2fb   :  { %3608 = vmatpush3.bf16.msra.mxu1 %v5660_v36 }
 0x2fc   :  { %3610 = vmatprep.subr.bf16.mxu1 %v5661_v52 }
 0x2ff   :  { %3612 = vmatpush3.bf16.msra.mxu1 %v5662_v11 }
 0x300   :  { %3614 = vmatprep.subr.bf16.mxu1 %v5663_v62 }
 0x303   :  { %3616 = vmatpush3.bf16.msra.mxu1 %v5664_v34 }
 0x304   :  { %3618 = vmatprep.subr.bf16.mxu1 %v5665_v47 }
 0x307   :  { %3620 = vmatpush3.bf16.msra.mxu1 %v5666_v7 }
 0x308   :  { %3622 = vmatprep.subr.bf16.mxu1 %v5667_v56 }
 0x30b   :  { %3624 = vmatpush3.bf16.msra.mxu1 %v5668_v33 }
 0x30c   :  { %3626 = vmatprep.subr.bf16.mxu1 %v5669_v22 }
 0x3c1   :  { %v1975_v15 = vpop.f32.mrb[64].mxu1 }
 0x3c2   :  { %v2150_v6 = vsel %vm2149_vm3, %v1975_v15, -inf  ;;  %v1977_v12 = vpop.f32.mrb[65].mxu1 }
 0x3c3   :  { %v2151_v26 = vrot.slane %v2150_v6, 4  ;;  %v2157_v51 = vsel %vm2149_vm3, %v1977_v12, -inf }
 0x3c4   :  { %v2158_v14 = vrot.slane %v2157_v51, 4 }
 0x3c5   :  { %v2152_v0 = vmax.f32 %v2150_v6, %v2151_v26 }
 0x3c6   :  { %v2159_v41 = vmax.f32 %v2157_v51, %v2158_v14 }
 0x3c7   :  { %v2153_v35 = vrot.slane %v2152_v0, 2 }
 0x3c8   :  { %v2160_v25 = vrot.slane %v2159_v41, 2 }
 0x3c9   :  { %v2154_v46 = vmax.f32 %v2152_v0, %v2153_v35 }
 0x3ca   :  { %v2161_v53 = vmax.f32 %v2159_v41, %v2160_v25 }
 0x3cb   :  { %v2155_v59 = vrot.slane %v2154_v46, 1  ;;  %v2144_v63 = vpop.f32.mrb[66].mxu0 }
 0x3cc   :  { %v2162_v42 = vrot.slane %v2161_v53, 1  ;;  %v2164_v24 = vsel %vm2149_vm3, %v2144_v63, -inf  ;;  %v2146_v45 = vpop.f32.mrb[67].mxu0 }
 0x3cd   :  { %v2156_v60 = vmax.f32 %v2154_v46, %v2155_v59  ;;  %v2165_v1 = vrot.slane %v2164_v24, 4  ;;  %v2171_v57 = vsel %vm2149_vm3, %v2146_v45, -inf }
 0x3ce   :  { %v2163_v21 = vmax.f32 %v2161_v53, %v2162_v42  ;;  %v2172_v61 = vrot.slane %v2171_v57, 4 }
 0x3cf   :  { %v2178_v38 = vsub.f32 %v1975_v15, %v2156_v60  ;;  %v2166_v13 = vmax.f32 %v2164_v24, %v2165_v1 }
 0x3d0   :  { %v2179_v10 = vsub.f32 %v1977_v12, %v2163_v21  ;;  %v2173_v3 = vmax.f32 %v2171_v57, %v2172_v61 }
 0x3d1   :  { %v2182_v58 = vmul.f32 1.442695, %v2178_v38  ;;  %v2167_v27 = vrot.slane %v2166_v13, 2 }
 0x3d2   :  { %v2184_v28 = vmul.f32 1.442695, %v2179_v10  ;;  %v2174_v31 = vrot.slane %v2173_v3, 2 }
 0x3d3   :  { %3815 = vpow2.f32 %v2182_v58  ;;  %v2168_v32 = vmax.f32 %v2166_v13, %v2167_v27 }
 0x3d4   :  { %3817 = vpow2.f32 %v2184_v28  ;;  %v2175_v49 = vmax.f32 %v2173_v3, %v2174_v31 }
 0x3d5   :  { %v2169_v9 = vrot.slane %v2168_v32, 1 }
 0x3d6   :  { %v2176_v23 = vrot.slane %v2175_v49, 1 }
 0x3d7   :  { %v2170_v36 = vmax.f32 %v2168_v32, %v2169_v9 }
 0x3d8   :  { %v2177_v52 = vmax.f32 %v2175_v49, %v2176_v23 }
 0x3d9   :  { %v2180_v11 = vsub.f32 %v2144_v63, %v2170_v36 }
 0x3da   :  { %v2181_v62 = vsub.f32 %v2146_v45, %v2177_v52 }
 0x3db   :  { %v2186_v34 = vmul.f32 1.442695, %v2180_v11 }
 0x3dc   :  { %v2188_v47 = vmul.f32 1.442695, %v2181_v62 }
 0x3dd   :  { %v3816_v7 = vpop.eup %3815  ;;  %3819 = vpow2.f32 %v2186_v34 }
 0x3de   :  { %v3818_v56 = vpop.eup %3817  ;;  %v2190_v33 = vsel %vm2149_vm3, %v3816_v7, 0.0  ;;  %3821 = vpow2.f32 %v2188_v47 }
 0x3df   :  { %v2191_v22 = vrot.slane %v2190_v33, 4  ;;  %v2197_v15 = vsel %vm2149_vm3, %v3818_v56, 0.0 }
 0x3e0   :  { %v2198_v6 = vrot.slane %v2197_v15, 4 }
 0x3e1   :  { %v2192_v12 = vadd.f32 %v2191_v22, %v2190_v33 }
 0x3e2   :  { %v2199_v26 = vadd.f32 %v2198_v6, %v2197_v15 }
 0x3e3   :  { %v2193_v51 = vrot.slane %v2192_v12, 2 }
 0x3e4   :  { %v2200_v14 = vrot.slane %v2199_v26, 2 }
 0x3e5   :  { %v2194_v0 = vadd.f32 %v2193_v51, %v2192_v12 }
 0x3e6   :  { %v2201_v41 = vadd.f32 %v2200_v14, %v2199_v26 }
 0x3e7   :  { %v3820_v35 = vpop.eup %3819  ;;  %v2195_v25 = vrot.slane %v2194_v0, 1 }
 0x3e8   :  { %v3822_v46 = vpop.eup %3821  ;;  %v2202_v53 = vrot.slane %v2201_v41, 1  ;;  %v2204_v59 = vsel %vm2149_vm3, %v3820_v35, 0.0 }
 0x3e9   :  { %v2196_v63 = vadd.f32 %v2195_v25, %v2194_v0  ;;  %v2205_v42 = vrot.slane %v2204_v59, 4  ;;  %v2211_v24 = vsel %vm2149_vm3, %v3822_v46, 0.0  ;;  %v5672_v25 = vpack.c.bf16 %v5134_v19, %v5124_v16  ;;  %v5683_v19 = vld [vmem:[#allocation13_spill] sm:$0xff] }
 0x3ea   :  { %v2203_v45 = vadd.f32 %v2202_v53, %v2201_v41  ;;  %v2212_v60 = vrot.slane %v2211_v24, 4  ;;  %v5670_v41 = vpack.c.bf16 %v5140_v44, %v5130_v20  ;;  %v5673_v53 = vpack.c.bf16 %v5252_v5, %v5246_v39  ;;  %v5679_v20 = vld [vmem:[#allocation8_spill] sm:$0xff]  ;;  %v5682_v5 = vld [vmem:[#allocation22_spill] sm:$0xff] }
 0x3eb   :  { %3823 = vrcp.f32 %v2196_v63  ;;  %v2206_v1 = vadd.f32 %v2205_v42, %v2204_v59  ;;  %v5674_v63 = vld [vmem:[#allocation11_spill] sm:$0xff]  ;;  %v5675_v42 = vld [vmem:[#allocation9_spill] sm:$0xff]  ;;  %v5677_v44 = vpack.c.bf16 %v5248_v17, %v5242_v8  ;;  %v5681_v16 = vpack.c.bf16 %v5280_v2, %v5274_v37  ;;  %v5689_v17 = vld [vmem:[#allocation16_spill] sm:$0xff] }
 0x3ec   :  { %3825 = vrcp.f32 %v2203_v45  ;;  %v2213_v57 = vadd.f32 %v2212_v60, %v2211_v24  ;;  %v5676_v24 = vpack.c.bf16 %v5674_v63, %v5675_v42  ;;  %v5684_v39 = vpack.c.bf16 %v5682_v5, %v5683_v19  ;;  %v5686_v60 = vld [vmem:[#allocation21_spill] sm:$0xff] }
 0x3ed   :  { %v2207_v21 = vrot.slane %v2206_v1, 2  ;;  %v5685_v45 = vpack.c.bf16 %v5276_v48, %v5272_v30  ;;  %v5692_v37 = vld [vmem:[#allocation17_spill] sm:$0xff] }
 0x3ee   :  { %v2214_v61 = vrot.slane %v2213_v57, 2 }
 0x3ef   :  { %v2208_v38 = vadd.f32 %v2207_v21, %v2206_v1  ;;  %v5687_v1 = vld [vmem:[#allocation12_spill] sm:$0xff]  ;;  %v5693_v21 = vpack.c.bf16 %v5299_v54, %v5692_v37  ;;  %v3658_v54 = vpack.c.bf16 %v2921_v55, %v2920_v18 }
 0x3f0   :  { %v2215_v13 = vadd.f32 %v2214_v61, %v2213_v57  ;;  %v5688_v8 = vpack.c.bf16 %v5686_v60, %v5687_v1  ;;  %v5690_v57 = vld [vmem:[#allocation15_spill] sm:$0xff]  ;;  %v5694_v61 = vld [vmem:[#allocation25_spill] sm:$0xff] }
 0x3f1   :  { %v2209_v10 = vrot.slane %v2208_v38, 1  ;;  %v5691_v2 = vpack.c.bf16 %v5689_v17, %v5690_v57  ;;  %3659 = vmatpush3.bf16.msra.mxu0 %v3658_v54 }
 0x3f2   :  { %v2216_v3 = vrot.slane %v2215_v13, 1  ;;  %3660 = vmatprep.subr.bf16.mxu0 %v5654_v40 }
 0x3f3   :  { %v2210_v58 = vadd.f32 %v2209_v10, %v2208_v38  ;;  %v5695_v38 = vld [vmem:[#allocation14_spill] sm:$0xff] }
 0x3f4   :  { %v2217_v27 = vadd.f32 %v2216_v3, %v2215_v13  ;;  %v5696_v30 = vpack.c.bf16 %v5694_v61, %v5695_v38  ;;  %v2923_v13 = vld [vmem:[%s5531_s3 + $0x38] sm:$0xff] }
 0x3f5   :  { %v3824_v28 = vpop.eup %3823  ;;  %3827 = vrcp.f32 %v2210_v58 }
 0x3f6   :  { %v3826_v31 = vpop.eup %3825  ;;  %3829 = vrcp.f32 %v2217_v27  ;;  %v2222_v32 = vmul.f32 %v3824_v28, %v3816_v7 }
 0x3f7   :  { %v2223_v49 = vmul.f32 %v3826_v31, %v3818_v56 }
 0x3f8   :  { %v2226_v9 = vsel %vm2149_vm3, %v2222_v32, 0.0 }
 0x3f9   :  { %v2227_v23 = vsel %vm2149_vm3, %v2223_v49, 0.0  ;;  %v2878_v36 = vcombine.low %v2222_v32, %v2223_v49 }
 0x3fa   :  { %v2228_v52 = vadd.f32 %v2227_v23, %v2226_v9  ;;  %v2924_v9 = vld [vmem:[%s5531_s3 + $0x40] sm:$0xff]  ;;  %v2925_v23 = vld [vmem:[%s5531_s3 + $0x48] sm:$0xff] }
 0x3fb   :  { %2882 = vst [vmem:[#allocation4] sm:$0xff] %v2878_v36  ;;  %v3664_v36 = vpack.c.bf16 %v2925_v23, %v2924_v9 }
 0x3fc   :  { %2229 = vadd.xlane.f32.xlu0 %v2228_v52  ;;  %v2926_v52 = vld [vmem:[%s5531_s3 + $0x50] sm:$0xff] }
 0x3ff   :  { %v3828_v11 = vpop.eup %3827 }
 0x400   :  { %v3830_v62 = vpop.eup %3829  ;;  %v2224_v34 = vmul.f32 %v3828_v11, %v3820_v35  ;;  %v5671_v35 = vpack.c.bf16 %v5230_v4, %v5226_v43  ;;  %v5678_v4 = vld [vmem:[#allocation10_spill] sm:$0xff]  ;;  %v2927_v11 = vld [vmem:[%s5531_s3 + $0x58] sm:$0xff] }
 0x401   :  { %v2225_v47 = vmul.f32 %v3830_v62, %v3822_v46  ;;  %v5680_v43 = vpack.c.bf16 %v5678_v4, %v5679_v20  ;;  %v3667_v62 = vpack.c.bf16 %v2927_v11, %v2926_v52 }
 0x402   :  { %v2231_v33 = vsel %vm2149_vm3, %v2224_v34, 0.0 }
 0x403   :  { %v2232_v22 = vsel %vm2149_vm3, %v2225_v47, 0.0  ;;  %v2879_v15 = vcombine.low %v2224_v34, %v2225_v47 }
 0x404   :  { %v2233_v6 = vadd.f32 %v2232_v22, %v2231_v33  ;;  %v3843_v33 = vld [vmem:[%s5528_s0] sm:$0xf] }
 0x405   :  { %2883 = vst [vmem:[#allocation4 + $0x8] sm:$0xff] %v2879_v15 }
 0x406   :  { %2234 = vadd.xlane.f32.xlu1 %v2233_v6 }
 0x489   :  { %v2230_v7 = vpop.xlane.xlu0 %2229 }
 0x48a   :  { %v2236_v56 = vadd.f32 1e-08, %v2230_v7 }
 0x48c   :  { %3831 = vrcp.f32 %v2236_v56 }
 0x493   :  { %v2235_v12 = vpop.xlane.xlu1 %2234 }
 0x494   :  { %v2237_v26 = vadd.f32 1e-08, %v2235_v12 }
 0x496   :  { %v3832_v51 = vpop.eup %3831  ;;  %3833 = vrcp.f32 %v2237_v26 }
 0x497   :  { %v2241_v14 = vmul.f32 %v3832_v51, %v2223_v49  ;;  %v2240_v0 = vmul.f32 %v3832_v51, %v2222_v32 }
 0x499   :  { %2308 = vmatprep.mubr.f32.mxu1 %v2241_v14 }
 0x49a   :  { %2309 = vmatmul.mubr.f32.vlgmr.msra.gmra.mrb[66].mxu1 %v2240_v0 }
 0x49b   :  { %3628 = vmatpush3.bf16.msra.mxu1 %v5670_v41 }
 0x49c   :  { %3630 = vmatprep.subr.bf16.mxu1 %v5671_v35 }
 0x49f   :  { %3632 = vmatpush3.bf16.msra.mxu1 %v5672_v25 }
 0x4a0   :  { %v3834_v46 = vpop.eup %3833  ;;  %3634 = vmatprep.subr.bf16.mxu1 %v5673_v53 }
 0x4a1   :  { %v2243_v59 = vmul.f32 %v3834_v46, %v2225_v47  ;;  %v2242_v48 = vmul.f32 %v3834_v46, %v2224_v34 }
 0x4a3   :  { %3636 = vmatpush3.bf16.msra.mxu1 %v5676_v24  ;;  %2378 = vmatprep.mubr.f32.mxu1 %v2243_v59 }
 0x4a4   :  { %3638 = vmatprep.subr.bf16.mxu1 %v5677_v44 }
 0x4a7   :  { %3640 = vmatpush3.bf16.msra.mxu1 %v5680_v43 }
 0x4a8   :  { %3642 = vmatprep.subr.bf16.mxu1 %v5681_v16 }
 0x4ab   :  { %3644 = vmatpush3.bf16.msra.mxu1 %v5684_v39 }
 0x4ac   :  { %3646 = vmatprep.subr.bf16.mxu1 %v5685_v45 }
 0x4af   :  { %3648 = vmatpush3.bf16.msra.mxu1 %v5688_v8 }
 0x4b0   :  { %3650 = vmatprep.subr.bf16.mxu1 %v3649_v50  ;;  %v2922_v50 = vld [vmem:[%s5531_s3 + $0x30] sm:$0xff] }
 0x4b1   :  { %v3661_v10 = vpack.c.bf16 %v2923_v13, %v2922_v50 }
 0x4b3   :  { %3652 = vmatpush3.bf16.msra.mxu1 %v5691_v2  ;;  %3662 = vmatpush3.bf16.msra.mxu0 %v3661_v10 }
 0x4b4   :  { %3654 = vmatprep.subr.bf16.mxu1 %v5693_v21  ;;  %3663 = vmatprep.subr.bf16.mxu0 %v5654_v40 }
 0x4b7   :  { %3656 = vmatpush3.bf16.msra.mxu1 %v5696_v30 }
 0x4b8   :  { %3460 = vmatprep.subr.mxu1 %v5659_v29 }
 0x4ba   :  { %2379 = vmatmul.mubr.f32.vlgmr.msra.gmra.mrb[68].mxu1 %v2242_v48 }
 0x4bb   :  { %3462 = vmatprep.mubr.msk.f32.mxu1 %vm3896_vm1, %v5659_v29 }
 0x56d   :  { %v3246_v3 = vpop.f32.mrb[66].mxu1 }
 0x56e   :  { %v3247_v58 = vpop.f32.mrb[67].mxu1 }
 0x56f   :  { %v3248_v27 = vadd.f32 %v3247_v58, %v3246_v3 }
 0x58d   :  { %v3281_v28 = vpop.f32.mrb[68].mxu1 }
 0x58e   :  { %v3282_v31 = vpop.f32.mrb[69].mxu1 }
 0x58f   :  { %v3283_v32 = vadd.f32 %v3282_v31, %v3281_v28 }
 0x591   :  { %v2386_v49 = vcombine.low %v3248_v27, %v3283_v32 }
 0x593   :  { %3458 = vmatmul.mubr.msk.f32.vlgmr.msra.gmra.mrb[68].mxu0 %vm109_vm0, %v2386_v49 }
 0x594   :  { %3478 = vmatprep.mubr.msk.f32.mxu0 %vm3896_vm1, %v5659_v29  ;;  %3665 = vmatpush3.bf16.msra.mxu0 %v3664_v36 }
 0x595   :  { %3666 = vmatprep.subr.bf16.mxu0 %v5654_v40  ;;  %v3844_v40 = vld [vmem:[%s5528_s0 + $0x4] sm:$0xf]  ;;  %s3898_s0 = smov [#allocation4]  }
 0x596   :  { %s2901_s3 = sshll.u32 %s3898_s0, 4  ;;  %s2902_s3 = int_to_ptr.vmem [resolvable:$true] %s2901_s3 }
 0x597   :  { %s3845_s7 = scalar_lea.vmem %s2902_s3, 256  ;;  %p3850_p1 = scmp.lt.s32.totalorder %s2902_s3, %s2902_s3 }
 0x598   :  { %3668 = vmatpush3.bf16.msra.mxu0 %v3667_v62  ;;  %p3846_p0 = scmp.ne.s32.totalorder %s2902_s3, %s3845_s7  ;;  %p3851_p2 = scmp.lt.s32.totalorder %s3845_s7, %s3845_s7 }
 0x59a   :  { %p3852_p3 = por %p3851_p2, %p3850_p1 }
 0x59c   :  { %p3853_p4 = pnand %p3852_p3, %p3846_p0 }
 0x666   :  { %v2455_v34 = vpop.f32.mrb[68].mxu0 }
 0x667   :  { %v2460_v47 = vcombine.high %v2455_v34, %v2455_v34  ;;  %v5469_v22 = vadd.f32 %v3843_v33, %v2455_v34  ;;  %v3459_v15 = vpop.f32.mrb[69].mxu0 }
 0x669   :  { %v5474_v6 = vadd.f32 %v3844_v40, %v2460_v47  ;;  %v2464_v7 = vmul.f32 0.17677669, %v5469_v22  ;;  %3461 = vmatpush3.xpose.msk.msra.mxu1 %vm109_vm0, %v5469_v22 }
 0x66a   :  { %3465 = vmatprep.subr.mxu1 %v5659_v29 }
 0x66b   :  { %v2641_v56 = vcombine.low %v5469_v22, %v5474_v6  ;;  %v2465_v12 = vmul.f32 0.17677669, %v5474_v6 }
 0x66c   :  { %3463 = vmatmul.mubr.msk.f32.vlgmr.msra.gmra.mrb[70].mxu1 %vm109_vm0, %v2464_v7 }
 0x66d   :  { %3466 = vmatpush3.xpose.msk.msra.mxu1 %vm109_vm0, %v5474_v6  ;;  %3479 = vmatmul.mubr.msk.f32.vlgmr.msra.gmra.mrb[70].mxu0 %vm109_vm0, %v2641_v56 }
 0x66e   :  { %3467 = vmatprep.mubr.msk.f32.mxu1 %vm3896_vm1, %v5659_v29  ;;  %3481 = vmatprep.subr.mxu1 %v5659_v29 }
 0x670   :  { %3468 = vmatmul.mubr.msk.f32.vlgmr.msra.gmra.mrb[72].mxu1 %vm109_vm0, %v2465_v12 }
 0x671   :  { %3483 = vmatprep.mubr.msk.f32.mxu1 %vm3896_vm1, %v5659_v29 }
 0x73f   :  { %v2538_v26 = vpop.f32.mrb[70].mxu1 }
 0x740   :  { %v3464_v51 = vpop.f32.mrb[71].mxu1  ;;  %v2710_v14 = vpop.f32.mrb[70].mxu0  ;;  %v2619_v0 = vsel %vm2618_vm4, %v2538_v26, -inf }
 0x741   :  { %2620 = vmax.xlane.f32.xlu0 %v2619_v0  ;;  %v3480_v41 = vpop.f32.mrb[71].mxu0  ;;  %3482 = vmatpush3.msk.msra.mxu1 %vm2149_vm3, %v2710_v14  ;;  %v2715_v60 = vcombine.high %v2710_v14, %v2710_v14 }
 0x742   :  { %3486 = vmatprep.subr.mxu1 %v5659_v29 }
 0x743   :  { %v2614_v35 = vpop.f32.mrb[72].mxu1 }
 0x744   :  { %v3469_v25 = vpop.f32.mrb[73].mxu1  ;;  %v2622_v46 = vsel %vm2618_vm4, %v2614_v35, -inf }
 0x745   :  { %2623 = vmax.xlane.f32.xlu1 %v2622_v46 }
 0x7ce   :  { %v2621_v53 = vpop.xlane.xlu0 %2620 }
 0x7cf   :  { %v2625_v59 = vsub.f32 %v2538_v26, %v2621_v53 }
 0x7d1   :  { %v2627_v63 = vmul.f32 1.442695, %v2625_v59 }
 0x7d2   :  { %v2624_v42 = vpop.xlane.xlu1 %2623 }
 0x7d3   :  { %3835 = vpow2.f32 %v2627_v63  ;;  %v2626_v24 = vsub.f32 %v2614_v35, %v2624_v42 }
 0x7d5   :  { %v2629_v44 = vmul.f32 1.442695, %v2626_v24 }
 0x7d7   :  { %3837 = vpow2.f32 %v2629_v44 }
 0x7dd   :  { %v3836_v4 = vpop.eup %3835 }
 0x7de   :  { %v2631_v20 = vsel %vm2618_vm4, %v3836_v4, 0.0 }
 0x7df   :  { %2632 = vadd.xlane.f32.xlu0 %v2631_v20 }
 0x7e1   :  { %v3838_v43 = vpop.eup %3837 }
 0x7e2   :  { %v2634_v16 = vsel %vm2618_vm4, %v3838_v43, 0.0 }
 0x7e3   :  { %2635 = vadd.xlane.f32.xlu1 %v2634_v16 }
 0x86c   :  { %v2633_v5 = vpop.xlane.xlu0 %2632 }
 0x86d   :  { %3839 = vrcp.f32 %v2633_v5 }
 0x870   :  { %v2636_v19 = vpop.xlane.xlu1 %2635 }
 0x871   :  { %3841 = vrcp.f32 %v2636_v19 }
 0x877   :  { %v3840_v39 = vpop.eup %3839 }
 0x878   :  { %v2639_v45 = vmul.f32 %v3840_v39, %v3836_v4 }
 0x87a   :  { %3484 = vmatmul.mubr.msk.f32.vlgmr.msra.gmra.mrb[74].mxu1 %vm2716_vm5, %v2639_v45 }
 0x87b   :  { %v3842_v1 = vpop.eup %3841  ;;  %3487 = vmatpush3.msk.msra.mxu1 %vm2149_vm3, %v2715_v60  ;;  %3488 = vmatprep.mubr.msk.f32.mxu1 %vm3896_vm1, %v5659_v29 }
 0x87c   :  { %v2640_v8 = vmul.f32 %v3842_v1, %v3838_v43 }
 0x87e   :  { %3489 = vmatmul.mubr.msk.f32.vlgmr.msra.gmra.mrb[76].mxu1 %vm2716_vm5, %v2640_v8 }
 0x87f   :  { %3856 = shalt.err (!%p3853_p4)
}
 0x880   :  { %s3857_s10 = scalar_lea.hbm %s5533_s5, 256 }
 0x881   :  { %p3858_p5 = scmp.ne.s32.totalorder %s5533_s5, %s3857_s10  ;;  %p3861_p6 = scmp.lt.u32.totalorder %s3857_s10, %s5533_s5 }
 0x883   :  { %p3863_p7 = pnand %p3861_p6, %p3858_p5 }
 0x885   :  { %3866 = shalt.err (!%p3863_p7)
}
 0x886   :  { %s3899_s15 = smov 128   ;;  %s3900_s16 = smov 8   ;;  %vm2871_vm6 = vcmask 257024  }
 0x887   :  { %2907 = dma.vmem_to_hbm [thread:$0]  %s2902_s3, 256, %s5533_s5, [#allocation5], %s3899_s15, %s3899_s15, %s3900_s16  }
 0x888   :  { %s3901_s2 = smov [#allocation2]  }
 0x889   :  { %s2889_s19 = sshll.u32 %s3901_s2, 4  ;;  %s2890_s19 = int_to_ptr.vmem [resolvable:$true] %s2889_s19 }
 0x88a   :  { %s3867_s20 = scalar_lea.vmem %s2890_s19, 128  ;;  %p3872_p9 = scmp.lt.s32.totalorder %s2890_s19, %s2890_s19 }
 0x88b   :  { %p3868_p8 = scmp.ne.s32.totalorder %s2890_s19, %s3867_s20  ;;  %p3873_p10 = scmp.lt.s32.totalorder %s3867_s20, %s3867_s20 }
 0x88d   :  { %p3874_p11 = por %p3873_p10, %p3872_p9 }
 0x88f   :  { %p3875_p12 = pnand %p3874_p11, %p3868_p8 }
 0x94d   :  { %v2788_v29 = vpop.f32.mrb[74].mxu1 }
 0x94e   :  { %v2867_v17 = vmax.f32 %v2788_v29, 0.0  ;;  %v3485_v57 = vpop.f32.mrb[75].mxu1 }
 0x950   :  { %v2869_v2 = vadd.f32 %v2867_v17, %v5469_v22 }
 0x951   :  { %v2863_v37 = vpop.f32.mrb[76].mxu1 }
 0x952   :  { %2872 = vst.msk [vmem:[#allocation2] sm:$0xf] %vm2871_vm6, %v2869_v2  ;;  %v2868_v21 = vmax.f32 %v2863_v37, 0.0  ;;  %v3490_v61 = vpop.f32.mrb[77].mxu1 }
 0x954   :  { %v2870_v38 = vadd.f32 %v2868_v21, %v5474_v6 }
 0x956   :  { %2873 = vst.msk [vmem:[#allocation2 + $0x4] sm:$0xf] %vm2871_vm6, %v2870_v38 }
 0x957   :  { %3878 = shalt.err (!%p3875_p12)
}
 0x958   :  { %s3879_s22 = scalar_lea.hbm %s5532_s4, 128 }
 0x959   :  { %p3880_p13 = scmp.ne.s32.totalorder %s5532_s4, %s3879_s22  ;;  %p3883_p0 = scmp.lt.u32.totalorder %s3879_s22, %s5532_s4 }
 0x95b   :  { %p3885_p1 = pnand %p3883_p0, %p3880_p13 }
 0x95d   :  { %3888 = shalt.err (!%p3885_p1)
}
 0x95e   :  { %s3902_s27 = smov 64   ;;  %s3903_s28 = smov 4  }
 0x95f   :  { %2895 = dma.vmem_to_hbm [thread:$0]  %s2890_s19, 128, %s5532_s4, [#allocation3], %s3902_s27, %s3902_s27, %s3903_s28  }
 0x960   :  { %3889 = dma.done.wait [#allocation3], 128  }
 0x961   :  { %3890 = vsyncadd [#allocation3], 4294967168 }
 0x962   :  { %3891 = dma.done.wait [#allocation5], 256  }
 0x963   :  { %3892 = vsyncadd [#allocation5], 4294967040 }
 0x964   :  { %2914 = vsyncpa [#allocation3], 1 }
 0x965   :  { %2915 = vsyncpa [#allocation5], 1 }

</bundles_post_ra>
